<compile_context>
chip_gen: v6e
topology: v6e:2x2x1
jax: 0.10.0
libtpu: 0.0.40
codegen_flags: <defaults>
</compile_context>

<pallas_src>
import math

import jax
import jax.numpy as jnp
from jax.experimental import pallas as pl
from jax.experimental.pallas import tpu as pltpu

# --- model config (small, consistent with Encoder(d_model, N, heads)) ---------
D_MODEL = 32
N_LAYERS = 2
HEADS = 4
D_K = D_MODEL // HEADS
D_FF = 128
BATCH = 2
SEQ = 8
EPS = 1e-6


# ------------------------------------------------------------------------------
# In-kernel helpers
# ------------------------------------------------------------------------------
def _layer_norm(x, alpha, beta):
    """torch Norm: alpha*(x-mean)/(std+eps)+beta, std is *unbiased* (N-1)."""
    mean = jnp.mean(x, axis=-1, keepdims=True)
    var = jnp.sum((x - mean) ** 2, axis=-1, keepdims=True) * (1.0 / (x.shape[-1] - 1))
    inv = pl.reciprocal(jnp.sqrt(var) + EPS, approx=True)   # EUP, not a VPU divide
    return alpha * (x - mean) * inv + beta


# ------------------------------------------------------------------------------
# Single fused Pallas kernel: N encoder layers + final norm, whole batch at once
# ------------------------------------------------------------------------------
def encoder_kernel(x_ref, mask_ref,
                   wq_ref, bq_ref, wk_ref, bk_ref, wv_ref, bv_ref,
                   wo_ref, bo_ref,
                   a1_ref, g1_ref, a2_ref, g2_ref,
                   w1_ref, b1_ref, w2_ref, b2_ref,
                   fa_ref, fb_ref,
                   o_ref):
    B, S, D = x_ref.shape
    scale = 1.0 / math.sqrt(D_K)

    # ---- load everything once (whole model ~50 KB, fits VMEM with huge margin)
    x = x_ref[...].reshape(B * S, D)      # fold batch onto sublanes
    wq, bq = wq_ref[...], bq_ref[...]
    wk, bk = wk_ref[...], bk_ref[...]
    wv, bv = wv_ref[...], bv_ref[...]
    wo, bo = wo_ref[...], bo_ref[...]
    a1, g1 = a1_ref[...], g1_ref[...]
    a2, g2 = a2_ref[...], g2_ref[...]
    w1, b1 = w1_ref[...], b1_ref[...]
    w2, b2 = w2_ref[...], b2_ref[...]

    # mask bias hoisted out of head & layer loops: (B, 1, S), nonzero mask = keep
    bias = jnp.where(mask_ref[...] == 0.0, -1e9, 0.0)

    # get_clones deep-copies one EncoderLayer -> all N layers share identical
    # initial parameters, so the same weight set is reused N times.
    for _ in range(N_LAYERS):
        # ---- sub-layer 1: pre-norm multi-head self-attention + residual -------
        x2 = _layer_norm(x, a1, g1)
        q = jnp.dot(x2, wq, preferred_element_type=jnp.float32) + bq
        k = jnp.dot(x2, wk, preferred_element_type=jnp.float32) + bk
        v = jnp.dot(x2, wv, preferred_element_type=jnp.float32) + bv
        q3 = q.reshape(B, S, D)
        k3 = k.reshape(B, S, D)
        v3 = v.reshape(B, S, D)

        head_outs = []
        for h in range(HEADS):                     # static 4-iteration unroll
            sl = slice(h * D_K, (h + 1) * D_K)     # head = static lane slice
            # batched over B, contraction expresses k^T (no explicit transpose)
            s = jnp.einsum('bqd,bkd->bqk', q3[:, :, sl], k3[:, :, sl],
                           preferred_element_type=jnp.float32) * scale  # (B,S,S)
            s = s + bias                           # broadcasts over query rows
            s = s - jnp.max(s, axis=-1, keepdims=True)
            e = jnp.exp(s)
            p = e * pl.reciprocal(jnp.sum(e, axis=-1, keepdims=True), approx=True)
            head_outs.append(jnp.einsum('bqk,bkd->bqd', p, v3[:, :, sl],
                                        preferred_element_type=jnp.float32))
        concat = jnp.concatenate(head_outs, axis=-1).reshape(B * S, D)
        x = x + jnp.dot(concat, wo, preferred_element_type=jnp.float32) + bo

        # ---- sub-layer 2: pre-norm feed-forward + residual ---------------------
        x2 = _layer_norm(x, a2, g2)
        h1 = jnp.maximum(jnp.dot(x2, w1, preferred_element_type=jnp.float32) + b1, 0.0)
        x = x + jnp.dot(h1, w2, preferred_element_type=jnp.float32) + b2

    # ---- final Norm ------------------------------------------------------------
    o_ref[...] = _layer_norm(x, fa_ref[...], fb_ref[...]).reshape(B, S, D)


# ------------------------------------------------------------------------------
# Wrapper: one pallas_call, single grid point, everything resident in VMEM
# ------------------------------------------------------------------------------
def encoder_forward(src, mask, layer_params, final_alpha, final_beta):
    args = (src, mask, *layer_params, final_alpha, final_beta)
    return pl.pallas_call(
        encoder_kernel,
        out_shape=jax.ShapeDtypeStruct(src.shape, src.dtype),
        in_specs=[pl.BlockSpec(memory_space=pltpu.MemorySpace.VMEM) for _ in args],
        out_specs=pl.BlockSpec(memory_space=pltpu.MemorySpace.VMEM),
    )(*args)


# ------------------------------------------------------------------------------
# Deterministic parameter init (synthetic; mirrors torch shapes, not values)
# ------------------------------------------------------------------------------
def init_params(key):
    def linear(k, fan_in, fan_out):
        k1, k2 = jax.random.split(k)
        bound = 1.0 / math.sqrt(fan_in)
        # stored as (in, out) so the kernel computes x @ W + b (== torch x @ W^T + b)
        w = jax.random.uniform(k1, (fan_in, fan_out), jnp.float32, -bound, bound)
        b = jax.random.uniform(k2, (1, fan_out), jnp.float32, -bound, bound)
        return w, b

    ks = jax.random.split(key, 6)
    wq, bq = linear(ks[0], D_MODEL, D_MODEL)
    wk, bk = linear(ks[1], D_MODEL, D_MODEL)
    wv, bv = linear(ks[2], D_MODEL, D_MODEL)
    wo, bo = linear(ks[3], D_MODEL, D_MODEL)
    w1, b1 = linear(ks[4], D_MODEL, D_FF)
    w2, b2 = linear(ks[5], D_FF, D_MODEL)
    a1 = jnp.ones((1, D_MODEL), jnp.float32)
    g1 = jnp.zeros((1, D_MODEL), jnp.float32)
    a2 = jnp.ones((1, D_MODEL), jnp.float32)
    g2 = jnp.zeros((1, D_MODEL), jnp.float32)
    layer_params = (wq, bq, wk, bk, wv, bv, wo, bo,
                    a1, g1, a2, g2, w1, b1, w2, b2)
    final_alpha = jnp.ones((1, D_MODEL), jnp.float32)
    final_beta = jnp.zeros((1, D_MODEL), jnp.float32)
    return layer_params, final_alpha, final_beta


# ------------------------------------------------------------------------------
# Pure-JAX reference (mirrors the PyTorch forward) for a sanity check
# ------------------------------------------------------------------------------
def encoder_ref(src, mask, layer_params, final_alpha, final_beta):
    def norm(x, a, b):
        mean = x.mean(-1, keepdims=True)
        var = jnp.sum((x - mean) ** 2, -1, keepdims=True) / (x.shape[-1] - 1)
        return a * (x - mean) / (jnp.sqrt(var) + EPS) + b

    (wq, bq, wk, bk, wv, bv, wo, bo,
     a1, g1, a2, g2, w1, b1, w2, b2) = layer_params
    x = src
    B, S, Dm = x.shape
    dk = Dm // HEADS
    for _ in range(N_LAYERS):
        x2 = norm(x, a1, g1)
        q = (x2 @ wq + bq).reshape(B, S, HEADS, dk).transpose(0, 2, 1, 3)
        k = (x2 @ wk + bk).reshape(B, S, HEADS, dk).transpose(0, 2, 1, 3)
        v = (x2 @ wv + bv).reshape(B, S, HEADS, dk).transpose(0, 2, 1, 3)
        s = jnp.einsum('bhqd,bhkd->bhqk', q, k) / math.sqrt(dk)
        m = mask[:, None, :, :]                      # (B,1,1,S)
        s = jnp.where(m == 0, -1e9, s)
        p = jax.nn.softmax(s, axis=-1)
        o = jnp.einsum('bhqk,bhkd->bhqd', p, v).transpose(0, 2, 1, 3).reshape(B, S, Dm)
        x = x + o @ wo + bo
        x2 = norm(x, a2, g2)
        x = x + jnp.maximum(x2 @ w1 + b1, 0.0) @ w2 + b2
    return norm(x, final_alpha, final_beta)


# ------------------------------------------------------------------------------
if __name__ == "__main__":
    key = jax.random.PRNGKey(0)
    k_src, k_param = jax.random.split(key)
    src = jax.random.normal(k_src, (BATCH, SEQ, D_MODEL), jnp.float32)
    # padding-style key mask: last two key positions of batch element 1 are masked
    mask = jnp.ones((BATCH, 1, SEQ), jnp.float32)
    mask = mask.at[1, 0, SEQ - 2:].set(0.0)

    layer_params, final_alpha, final_beta = init_params(k_param)

    out = encoder_forward(src, mask, layer_params, final_alpha, final_beta)
    out = jax.block_until_ready(out)

    ref = encoder_ref(src, mask, layer_params, final_alpha, final_beta)
    assert out.shape == (BATCH, SEQ, D_MODEL)
    assert bool(jnp.all(jnp.isfinite(out)))
    assert bool(jnp.allclose(out, ref, rtol=2e-2, atol=2e-2)), "mismatch vs reference"

    print("KERNEL_OK")
</pallas_src>

<mosaic_0001>
module attributes {stable_mosaic.version = 11 : i64} {
  func.func @encoder_kernel(%arg0: memref<2x8x32xf32, #tpu.memory_space<vmem>>, %arg1: memref<2x1x8xf32, #tpu.memory_space<vmem>>, %arg2: memref<32x32xf32, #tpu.memory_space<vmem>>, %arg3: memref<1x32xf32, #tpu.memory_space<vmem>>, %arg4: memref<32x32xf32, #tpu.memory_space<vmem>>, %arg5: memref<1x32xf32, #tpu.memory_space<vmem>>, %arg6: memref<32x32xf32, #tpu.memory_space<vmem>>, %arg7: memref<1x32xf32, #tpu.memory_space<vmem>>, %arg8: memref<32x32xf32, #tpu.memory_space<vmem>>, %arg9: memref<1x32xf32, #tpu.memory_space<vmem>>, %arg10: memref<1x32xf32, #tpu.memory_space<vmem>>, %arg11: memref<1x32xf32, #tpu.memory_space<vmem>>, %arg12: memref<1x32xf32, #tpu.memory_space<vmem>>, %arg13: memref<1x32xf32, #tpu.memory_space<vmem>>, %arg14: memref<32x128xf32, #tpu.memory_space<vmem>>, %arg15: memref<1x128xf32, #tpu.memory_space<vmem>>, %arg16: memref<128x32xf32, #tpu.memory_space<vmem>>, %arg17: memref<1x32xf32, #tpu.memory_space<vmem>>, %arg18: memref<1x32xf32, #tpu.memory_space<vmem>>, %arg19: memref<1x32xf32, #tpu.memory_space<vmem>>, %arg20: memref<2x8x32xf32, #tpu.memory_space<vmem>>) attributes {dimension_semantics = [], scalar_prefetch = 0 : i64, scratch_operands = 0 : i64, tpu.core_type = #tpu.core_type<tc>} {
    %c0 = arith.constant 0 : index
    %c0_0 = arith.constant 0 : index
    %c0_1 = arith.constant 0 : index
    %0 = vector.load %arg0[%c0, %c0_0, %c0_1] : memref<2x8x32xf32, #tpu.memory_space<vmem>>, vector<2x8x32xf32>
    %1 = vector.shape_cast %0 : vector<2x8x32xf32> to vector<16x32xf32>
    %c0_2 = arith.constant 0 : index
    %c0_3 = arith.constant 0 : index
    %2 = vector.load %arg2[%c0_2, %c0_3] : memref<32x32xf32, #tpu.memory_space<vmem>>, vector<32x32xf32>
    %c0_4 = arith.constant 0 : index
    %c0_5 = arith.constant 0 : index
    %3 = vector.load %arg3[%c0_4, %c0_5] : memref<1x32xf32, #tpu.memory_space<vmem>>, vector<1x32xf32>
    %c0_6 = arith.constant 0 : index
    %c0_7 = arith.constant 0 : index
    %4 = vector.load %arg4[%c0_6, %c0_7] : memref<32x32xf32, #tpu.memory_space<vmem>>, vector<32x32xf32>
    %c0_8 = arith.constant 0 : index
    %c0_9 = arith.constant 0 : index
    %5 = vector.load %arg5[%c0_8, %c0_9] : memref<1x32xf32, #tpu.memory_space<vmem>>, vector<1x32xf32>
    %c0_10 = arith.constant 0 : index
    %c0_11 = arith.constant 0 : index
    %6 = vector.load %arg6[%c0_10, %c0_11] : memref<32x32xf32, #tpu.memory_space<vmem>>, vector<32x32xf32>
    %c0_12 = arith.constant 0 : index
    %c0_13 = arith.constant 0 : index
    %7 = vector.load %arg7[%c0_12, %c0_13] : memref<1x32xf32, #tpu.memory_space<vmem>>, vector<1x32xf32>
    %c0_14 = arith.constant 0 : index
    %c0_15 = arith.constant 0 : index
    %8 = vector.load %arg8[%c0_14, %c0_15] : memref<32x32xf32, #tpu.memory_space<vmem>>, vector<32x32xf32>
    %c0_16 = arith.constant 0 : index
    %c0_17 = arith.constant 0 : index
    %9 = vector.load %arg9[%c0_16, %c0_17] : memref<1x32xf32, #tpu.memory_space<vmem>>, vector<1x32xf32>
    %c0_18 = arith.constant 0 : index
    %c0_19 = arith.constant 0 : index
    %10 = vector.load %arg10[%c0_18, %c0_19] : memref<1x32xf32, #tpu.memory_space<vmem>>, vector<1x32xf32>
    %c0_20 = arith.constant 0 : index
    %c0_21 = arith.constant 0 : index
    %11 = vector.load %arg11[%c0_20, %c0_21] : memref<1x32xf32, #tpu.memory_space<vmem>>, vector<1x32xf32>
    %c0_22 = arith.constant 0 : index
    %c0_23 = arith.constant 0 : index
    %12 = vector.load %arg12[%c0_22, %c0_23] : memref<1x32xf32, #tpu.memory_space<vmem>>, vector<1x32xf32>
    %c0_24 = arith.constant 0 : index
    %c0_25 = arith.constant 0 : index
    %13 = vector.load %arg13[%c0_24, %c0_25] : memref<1x32xf32, #tpu.memory_space<vmem>>, vector<1x32xf32>
    %c0_26 = arith.constant 0 : index
    %c0_27 = arith.constant 0 : index
    %14 = vector.load %arg14[%c0_26, %c0_27] : memref<32x128xf32, #tpu.memory_space<vmem>>, vector<32x128xf32>
    %c0_28 = arith.constant 0 : index
    %c0_29 = arith.constant 0 : index
    %15 = vector.load %arg15[%c0_28, %c0_29] : memref<1x128xf32, #tpu.memory_space<vmem>>, vector<1x128xf32>
    %c0_30 = arith.constant 0 : index
    %c0_31 = arith.constant 0 : index
    %16 = vector.load %arg16[%c0_30, %c0_31] : memref<128x32xf32, #tpu.memory_space<vmem>>, vector<128x32xf32>
    %c0_32 = arith.constant 0 : index
    %c0_33 = arith.constant 0 : index
    %17 = vector.load %arg17[%c0_32, %c0_33] : memref<1x32xf32, #tpu.memory_space<vmem>>, vector<1x32xf32>
    %c0_34 = arith.constant 0 : index
    %c0_35 = arith.constant 0 : index
    %c0_36 = arith.constant 0 : index
    %18 = vector.load %arg1[%c0_34, %c0_35, %c0_36] : memref<2x1x8xf32, #tpu.memory_space<vmem>>, vector<2x1x8xf32>
    %cst = arith.constant 0.000000e+00 : f32
    %19 = vector.broadcast %cst : f32 to vector<2x1x8xf32>
    %20 = arith.cmpf oeq, %18, %19 : vector<2x1x8xf32>
    %cst_37 = arith.constant -1.000000e+09 : f32
    %cst_38 = arith.constant 0.000000e+00 : f32
    %21 = vector.broadcast %cst_37 : f32 to vector<2x1x8xf32>
    %22 = vector.broadcast %cst_38 : f32 to vector<2x1x8xf32>
    %23 = arith.select %20, %21, %22 : vector<2x1x8xi1>, vector<2x1x8xf32>
    %cst_39 = arith.constant dense<0.000000e+00> : vector<16xf32>
    %24 = vector.multi_reduction <add>, %1, %cst_39 [1] : vector<16x32xf32> to vector<16xf32>
    %25 = vector.shape_cast %24 : vector<16xf32> to vector<16x1xf32>
    %cst_40 = arith.constant 3.200000e+01 : f32
    %26 = vector.broadcast %cst_40 : f32 to vector<16x1xf32>
    %27 = arith.divf %25, %26 : vector<16x1xf32>
    %28 = vector.broadcast %27 : vector<16x1xf32> to vector<16x32xf32>
    %29 = arith.subf %1, %28 : vector<16x32xf32>
    %30 = arith.mulf %29, %29 : vector<16x32xf32>
    %cst_41 = arith.constant dense<0.000000e+00> : vector<16xf32>
    %31 = vector.multi_reduction <add>, %30, %cst_41 [1] : vector<16x32xf32> to vector<16xf32>
    %32 = vector.shape_cast %31 : vector<16xf32> to vector<16x1xf32>
    %cst_42 = arith.constant 0.0322580636 : f32
    %33 = vector.broadcast %cst_42 : f32 to vector<16x1xf32>
    %34 = arith.mulf %32, %33 : vector<16x1xf32>
    %35 = math.sqrt %34 : vector<16x1xf32>
    %cst_43 = arith.constant 9.99999997E-7 : f32
    %36 = vector.broadcast %cst_43 : f32 to vector<16x1xf32>
    %37 = arith.addf %35, %36 : vector<16x1xf32>
    %38 = tpu.reciprocal %37 {approx = true} : vector<16x1xf32> -> vector<16x1xf32>
    %39 = vector.broadcast %27 : vector<16x1xf32> to vector<16x32xf32>
    %40 = arith.subf %1, %39 : vector<16x32xf32>
    %41 = vector.broadcast %10 : vector<1x32xf32> to vector<16x32xf32>
    %42 = arith.mulf %41, %40 : vector<16x32xf32>
    %43 = vector.broadcast %38 : vector<16x1xf32> to vector<16x32xf32>
    %44 = arith.mulf %42, %43 : vector<16x32xf32>
    %45 = vector.broadcast %11 : vector<1x32xf32> to vector<16x32xf32>
    %46 = arith.addf %44, %45 : vector<16x32xf32>
    %cst_44 = arith.constant dense<0.000000e+00> : vector<16x32xf32>
    %47 = tpu.matmul %46, %2, %cst_44 {dimension_numbers = #tpu.dot_dimension_numbers<[1], [0], [0], [1], [0, 0, 1, 1], [], []>} : vector<16x32xf32>, vector<32x32xf32>, vector<16x32xf32> -> vector<16x32xf32>
    %48 = vector.broadcast %3 : vector<1x32xf32> to vector<16x32xf32>
    %49 = arith.addf %47, %48 : vector<16x32xf32>
    %cst_45 = arith.constant dense<0.000000e+00> : vector<16x32xf32>
    %50 = tpu.matmul %46, %4, %cst_45 {dimension_numbers = #tpu.dot_dimension_numbers<[1], [0], [0], [1], [0, 0, 1, 1], [], []>} : vector<16x32xf32>, vector<32x32xf32>, vector<16x32xf32> -> vector<16x32xf32>
    %51 = vector.broadcast %5 : vector<1x32xf32> to vector<16x32xf32>
    %52 = arith.addf %50, %51 : vector<16x32xf32>
    %cst_46 = arith.constant dense<0.000000e+00> : vector<16x32xf32>
    %53 = tpu.matmul %46, %6, %cst_46 {dimension_numbers = #tpu.dot_dimension_numbers<[1], [0], [0], [1], [0, 0, 1, 1], [], []>} : vector<16x32xf32>, vector<32x32xf32>, vector<16x32xf32> -> vector<16x32xf32>
    %54 = vector.broadcast %7 : vector<1x32xf32> to vector<16x32xf32>
    %55 = arith.addf %53, %54 : vector<16x32xf32>
    %56 = vector.shape_cast %49 : vector<16x32xf32> to vector<2x8x32xf32>
    %57 = vector.shape_cast %52 : vector<16x32xf32> to vector<2x8x32xf32>
    %58 = vector.shape_cast %55 : vector<16x32xf32> to vector<2x8x32xf32>
    %59 = vector.extract_strided_slice %56 {offsets = [0, 0, 0], sizes = [2, 8, 8], strides = [1, 1, 1]} : vector<2x8x32xf32> to vector<2x8x8xf32>
    %60 = vector.extract_strided_slice %57 {offsets = [0, 0, 0], sizes = [2, 8, 8], strides = [1, 1, 1]} : vector<2x8x32xf32> to vector<2x8x8xf32>
    "tpu.trace_start"() <{level = 10 : i32, message = "bqd,bkd->bqk"}> : () -> ()
    %cst_47 = arith.constant dense<0.000000e+00> : vector<2x8x8xf32>
    %61 = tpu.matmul %59, %60, %cst_47 {dimension_numbers = #tpu.dot_dimension_numbers<[2], [2], [1], [1], [0, 0, 0, 1, 1, 1], [0], [0]>} : vector<2x8x8xf32>, vector<2x8x8xf32>, vector<2x8x8xf32> -> vector<2x8x8xf32>
    "tpu.trace_stop"() : () -> ()
    %cst_48 = arith.constant 0.353553385 : f32
    %62 = vector.broadcast %cst_48 : f32 to vector<2x8x8xf32>
    %63 = arith.mulf %61, %62 : vector<2x8x8xf32>
    %64 = vector.broadcast %23 : vector<2x1x8xf32> to vector<2x8x8xf32>
    %65 = arith.addf %63, %64 : vector<2x8x8xf32>
    %cst_49 = arith.constant dense<0xFF800000> : vector<2x8xf32>
    %66 = vector.multi_reduction <maximumf>, %65, %cst_49 [2] : vector<2x8x8xf32> to vector<2x8xf32>
    %67 = vector.shape_cast %66 : vector<2x8xf32> to vector<2x8x1xf32>
    %68 = vector.broadcast %67 : vector<2x8x1xf32> to vector<2x8x8xf32>
    %69 = arith.subf %65, %68 : vector<2x8x8xf32>
    %70 = math.exp %69 : vector<2x8x8xf32>
    %cst_50 = arith.constant dense<0.000000e+00> : vector<2x8xf32>
    %71 = vector.multi_reduction <add>, %70, %cst_50 [2] : vector<2x8x8xf32> to vector<2x8xf32>
    %72 = vector.shape_cast %71 : vector<2x8xf32> to vector<2x8x1xf32>
    %73 = tpu.reciprocal %72 {approx = true} : vector<2x8x1xf32> -> vector<2x8x1xf32>
    %74 = vector.broadcast %73 : vector<2x8x1xf32> to vector<2x8x8xf32>
    %75 = arith.mulf %70, %74 : vector<2x8x8xf32>
    %76 = vector.extract_strided_slice %58 {offsets = [0, 0, 0], sizes = [2, 8, 8], strides = [1, 1, 1]} : vector<2x8x32xf32> to vector<2x8x8xf32>
    "tpu.trace_start"() <{level = 10 : i32, message = "bqk,bkd->bqd"}> : () -> ()
    %cst_51 = arith.constant dense<0.000000e+00> : vector<2x8x8xf32>
    %77 = tpu.matmul %75, %76, %cst_51 {dimension_numbers = #tpu.dot_dimension_numbers<[2], [1], [1], [2], [0, 0, 0, 1, 1, 2], [0], [0]>} : vector<2x8x8xf32>, vector<2x8x8xf32>, vector<2x8x8xf32> -> vector<2x8x8xf32>
    "tpu.trace_stop"() : () -> ()
    %78 = vector.extract_strided_slice %56 {offsets = [0, 0, 8], sizes = [2, 8, 8], strides = [1, 1, 1]} : vector<2x8x32xf32> to vector<2x8x8xf32>
    %79 = vector.extract_strided_slice %57 {offsets = [0, 0, 8], sizes = [2, 8, 8], strides = [1, 1, 1]} : vector<2x8x32xf32> to vector<2x8x8xf32>
    "tpu.trace_start"() <{level = 10 : i32, message = "bqd,bkd->bqk"}> : () -> ()
    %cst_52 = arith.constant dense<0.000000e+00> : vector<2x8x8xf32>
    %80 = tpu.matmul %78, %79, %cst_52 {dimension_numbers = #tpu.dot_dimension_numbers<[2], [2], [1], [1], [0, 0, 0, 1, 1, 1], [0], [0]>} : vector<2x8x8xf32>, vector<2x8x8xf32>, vector<2x8x8xf32> -> vector<2x8x8xf32>
    "tpu.trace_stop"() : () -> ()
    %cst_53 = arith.constant 0.353553385 : f32
    %81 = vector.broadcast %cst_53 : f32 to vector<2x8x8xf32>
    %82 = arith.mulf %80, %81 : vector<2x8x8xf32>
    %83 = vector.broadcast %23 : vector<2x1x8xf32> to vector<2x8x8xf32>
    %84 = arith.addf %82, %83 : vector<2x8x8xf32>
    %cst_54 = arith.constant dense<0xFF800000> : vector<2x8xf32>
    %85 = vector.multi_reduction <maximumf>, %84, %cst_54 [2] : vector<2x8x8xf32> to vector<2x8xf32>
    %86 = vector.shape_cast %85 : vector<2x8xf32> to vector<2x8x1xf32>
    %87 = vector.broadcast %86 : vector<2x8x1xf32> to vector<2x8x8xf32>
    %88 = arith.subf %84, %87 : vector<2x8x8xf32>
    %89 = math.exp %88 : vector<2x8x8xf32>
    %cst_55 = arith.constant dense<0.000000e+00> : vector<2x8xf32>
    %90 = vector.multi_reduction <add>, %89, %cst_55 [2] : vector<2x8x8xf32> to vector<2x8xf32>
    %91 = vector.shape_cast %90 : vector<2x8xf32> to vector<2x8x1xf32>
    %92 = tpu.reciprocal %91 {approx = true} : vector<2x8x1xf32> -> vector<2x8x1xf32>
    %93 = vector.broadcast %92 : vector<2x8x1xf32> to vector<2x8x8xf32>
    %94 = arith.mulf %89, %93 : vector<2x8x8xf32>
    %95 = vector.extract_strided_slice %58 {offsets = [0, 0, 8], sizes = [2, 8, 8], strides = [1, 1, 1]} : vector<2x8x32xf32> to vector<2x8x8xf32>
    "tpu.trace_start"() <{level = 10 : i32, message = "bqk,bkd->bqd"}> : () -> ()
    %cst_56 = arith.constant dense<0.000000e+00> : vector<2x8x8xf32>
    %96 = tpu.matmul %94, %95, %cst_56 {dimension_numbers = #tpu.dot_dimension_numbers<[2], [1], [1], [2], [0, 0, 0, 1, 1, 2], [0], [0]>} : vector<2x8x8xf32>, vector<2x8x8xf32>, vector<2x8x8xf32> -> vector<2x8x8xf32>
    "tpu.trace_stop"() : () -> ()
    %97 = vector.extract_strided_slice %56 {offsets = [0, 0, 16], sizes = [2, 8, 8], strides = [1, 1, 1]} : vector<2x8x32xf32> to vector<2x8x8xf32>
    %98 = vector.extract_strided_slice %57 {offsets = [0, 0, 16], sizes = [2, 8, 8], strides = [1, 1, 1]} : vector<2x8x32xf32> to vector<2x8x8xf32>
    "tpu.trace_start"() <{level = 10 : i32, message = "bqd,bkd->bqk"}> : () -> ()
    %cst_57 = arith.constant dense<0.000000e+00> : vector<2x8x8xf32>
    %99 = tpu.matmul %97, %98, %cst_57 {dimension_numbers = #tpu.dot_dimension_numbers<[2], [2], [1], [1], [0, 0, 0, 1, 1, 1], [0], [0]>} : vector<2x8x8xf32>, vector<2x8x8xf32>, vector<2x8x8xf32> -> vector<2x8x8xf32>
    "tpu.trace_stop"() : () -> ()
    %cst_58 = arith.constant 0.353553385 : f32
    %100 = vector.broadcast %cst_58 : f32 to vector<2x8x8xf32>
    %101 = arith.mulf %99, %100 : vector<2x8x8xf32>
    %102 = vector.broadcast %23 : vector<2x1x8xf32> to vector<2x8x8xf32>
    %103 = arith.addf %101, %102 : vector<2x8x8xf32>
    %cst_59 = arith.constant dense<0xFF800000> : vector<2x8xf32>
    %104 = vector.multi_reduction <maximumf>, %103, %cst_59 [2] : vector<2x8x8xf32> to vector<2x8xf32>
    %105 = vector.shape_cast %104 : vector<2x8xf32> to vector<2x8x1xf32>
    %106 = vector.broadcast %105 : vector<2x8x1xf32> to vector<2x8x8xf32>
    %107 = arith.subf %103, %106 : vector<2x8x8xf32>
    %108 = math.exp %107 : vector<2x8x8xf32>
    %cst_60 = arith.constant dense<0.000000e+00> : vector<2x8xf32>
    %109 = vector.multi_reduction <add>, %108, %cst_60 [2] : vector<2x8x8xf32> to vector<2x8xf32>
    %110 = vector.shape_cast %109 : vector<2x8xf32> to vector<2x8x1xf32>
    %111 = tpu.reciprocal %110 {approx = true} : vector<2x8x1xf32> -> vector<2x8x1xf32>
    %112 = vector.broadcast %111 : vector<2x8x1xf32> to vector<2x8x8xf32>
    %113 = arith.mulf %108, %112 : vector<2x8x8xf32>
    %114 = vector.extract_strided_slice %58 {offsets = [0, 0, 16], sizes = [2, 8, 8], strides = [1, 1, 1]} : vector<2x8x32xf32> to vector<2x8x8xf32>
    "tpu.trace_start"() <{level = 10 : i32, message = "bqk,bkd->bqd"}> : () -> ()
    %cst_61 = arith.constant dense<0.000000e+00> : vector<2x8x8xf32>
    %115 = tpu.matmul %113, %114, %cst_61 {dimension_numbers = #tpu.dot_dimension_numbers<[2], [1], [1], [2], [0, 0, 0, 1, 1, 2], [0], [0]>} : vector<2x8x8xf32>, vector<2x8x8xf32>, vector<2x8x8xf32> -> vector<2x8x8xf32>
    "tpu.trace_stop"() : () -> ()
    %116 = vector.extract_strided_slice %56 {offsets = [0, 0, 24], sizes = [2, 8, 8], strides = [1, 1, 1]} : vector<2x8x32xf32> to vector<2x8x8xf32>
    %117 = vector.extract_strided_slice %57 {offsets = [0, 0, 24], sizes = [2, 8, 8], strides = [1, 1, 1]} : vector<2x8x32xf32> to vector<2x8x8xf32>
    "tpu.trace_start"() <{level = 10 : i32, message = "bqd,bkd->bqk"}> : () -> ()
    %cst_62 = arith.constant dense<0.000000e+00> : vector<2x8x8xf32>
    %118 = tpu.matmul %116, %117, %cst_62 {dimension_numbers = #tpu.dot_dimension_numbers<[2], [2], [1], [1], [0, 0, 0, 1, 1, 1], [0], [0]>} : vector<2x8x8xf32>, vector<2x8x8xf32>, vector<2x8x8xf32> -> vector<2x8x8xf32>
    "tpu.trace_stop"() : () -> ()
    %cst_63 = arith.constant 0.353553385 : f32
    %119 = vector.broadcast %cst_63 : f32 to vector<2x8x8xf32>
    %120 = arith.mulf %118, %119 : vector<2x8x8xf32>
    %121 = vector.broadcast %23 : vector<2x1x8xf32> to vector<2x8x8xf32>
    %122 = arith.addf %120, %121 : vector<2x8x8xf32>
    %cst_64 = arith.constant dense<0xFF800000> : vector<2x8xf32>
    %123 = vector.multi_reduction <maximumf>, %122, %cst_64 [2] : vector<2x8x8xf32> to vector<2x8xf32>
    %124 = vector.shape_cast %123 : vector<2x8xf32> to vector<2x8x1xf32>
    %125 = vector.broadcast %124 : vector<2x8x1xf32> to vector<2x8x8xf32>
    %126 = arith.subf %122, %125 : vector<2x8x8xf32>
    %127 = math.exp %126 : vector<2x8x8xf32>
    %cst_65 = arith.constant dense<0.000000e+00> : vector<2x8xf32>
    %128 = vector.multi_reduction <add>, %127, %cst_65 [2] : vector<2x8x8xf32> to vector<2x8xf32>
    %129 = vector.shape_cast %128 : vector<2x8xf32> to vector<2x8x1xf32>
    %130 = tpu.reciprocal %129 {approx = true} : vector<2x8x1xf32> -> vector<2x8x1xf32>
    %131 = vector.broadcast %130 : vector<2x8x1xf32> to vector<2x8x8xf32>
    %132 = arith.mulf %127, %131 : vector<2x8x8xf32>
    %133 = vector.extract_strided_slice %58 {offsets = [0, 0, 24], sizes = [2, 8, 8], strides = [1, 1, 1]} : vector<2x8x32xf32> to vector<2x8x8xf32>
    "tpu.trace_start"() <{level = 10 : i32, message = "bqk,bkd->bqd"}> : () -> ()
    %cst_66 = arith.constant dense<0.000000e+00> : vector<2x8x8xf32>
    %134 = tpu.matmul %132, %133, %cst_66 {dimension_numbers = #tpu.dot_dimension_numbers<[2], [1], [1], [2], [0, 0, 0, 1, 1, 2], [0], [0]>} : vector<2x8x8xf32>, vector<2x8x8xf32>, vector<2x8x8xf32> -> vector<2x8x8xf32>
    "tpu.trace_stop"() : () -> ()
    %135 = tpu.concatenate %77, %96, %115, %134 in 2 : vector<2x8x8xf32>, vector<2x8x8xf32>, vector<2x8x8xf32>, vector<2x8x8xf32> -> vector<2x8x32xf32>
    %136 = vector.shape_cast %135 : vector<2x8x32xf32> to vector<16x32xf32>
    %cst_67 = arith.constant dense<0.000000e+00> : vector<16x32xf32>
    %137 = tpu.matmul %136, %8, %cst_67 {dimension_numbers = #tpu.dot_dimension_numbers<[1], [0], [0], [1], [0, 0, 1, 1], [], []>} : vector<16x32xf32>, vector<32x32xf32>, vector<16x32xf32> -> vector<16x32xf32>
    %138 = arith.addf %1, %137 : vector<16x32xf32>
    %139 = vector.broadcast %9 : vector<1x32xf32> to vector<16x32xf32>
    %140 = arith.addf %138, %139 : vector<16x32xf32>
    %cst_68 = arith.constant dense<0.000000e+00> : vector<16xf32>
    %141 = vector.multi_reduction <add>, %140, %cst_68 [1] : vector<16x32xf32> to vector<16xf32>
    %142 = vector.shape_cast %141 : vector<16xf32> to vector<16x1xf32>
    %cst_69 = arith.constant 3.200000e+01 : f32
    %143 = vector.broadcast %cst_69 : f32 to vector<16x1xf32>
    %144 = arith.divf %142, %143 : vector<16x1xf32>
    %145 = vector.broadcast %144 : vector<16x1xf32> to vector<16x32xf32>
    %146 = arith.subf %140, %145 : vector<16x32xf32>
    %147 = arith.mulf %146, %146 : vector<16x32xf32>
    %cst_70 = arith.constant dense<0.000000e+00> : vector<16xf32>
    %148 = vector.multi_reduction <add>, %147, %cst_70 [1] : vector<16x32xf32> to vector<16xf32>
    %149 = vector.shape_cast %148 : vector<16xf32> to vector<16x1xf32>
    %cst_71 = arith.constant 0.0322580636 : f32
    %150 = vector.broadcast %cst_71 : f32 to vector<16x1xf32>
    %151 = arith.mulf %149, %150 : vector<16x1xf32>
    %152 = math.sqrt %151 : vector<16x1xf32>
    %cst_72 = arith.constant 9.99999997E-7 : f32
    %153 = vector.broadcast %cst_72 : f32 to vector<16x1xf32>
    %154 = arith.addf %152, %153 : vector<16x1xf32>
    %155 = tpu.reciprocal %154 {approx = true} : vector<16x1xf32> -> vector<16x1xf32>
    %156 = vector.broadcast %144 : vector<16x1xf32> to vector<16x32xf32>
    %157 = arith.subf %140, %156 : vector<16x32xf32>
    %158 = vector.broadcast %12 : vector<1x32xf32> to vector<16x32xf32>
    %159 = arith.mulf %158, %157 : vector<16x32xf32>
    %160 = vector.broadcast %155 : vector<16x1xf32> to vector<16x32xf32>
    %161 = arith.mulf %159, %160 : vector<16x32xf32>
    %162 = vector.broadcast %13 : vector<1x32xf32> to vector<16x32xf32>
    %163 = arith.addf %161, %162 : vector<16x32xf32>
    %cst_73 = arith.constant dense<0.000000e+00> : vector<16x128xf32>
    %164 = tpu.matmul %163, %14, %cst_73 {dimension_numbers = #tpu.dot_dimension_numbers<[1], [0], [0], [1], [0, 0, 1, 1], [], []>} : vector<16x32xf32>, vector<32x128xf32>, vector<16x128xf32> -> vector<16x128xf32>
    %165 = vector.broadcast %15 : vector<1x128xf32> to vector<16x128xf32>
    %166 = arith.addf %164, %165 : vector<16x128xf32>
    %cst_74 = arith.constant 0.000000e+00 : f32
    %167 = vector.broadcast %cst_74 : f32 to vector<16x128xf32>
    %168 = arith.maximumf %166, %167 : vector<16x128xf32>
    %cst_75 = arith.constant dense<0.000000e+00> : vector<16x32xf32>
    %169 = tpu.matmul %168, %16, %cst_75 {dimension_numbers = #tpu.dot_dimension_numbers<[1], [0], [0], [1], [0, 0, 1, 1], [], []>} : vector<16x128xf32>, vector<128x32xf32>, vector<16x32xf32> -> vector<16x32xf32>
    %170 = arith.addf %140, %169 : vector<16x32xf32>
    %171 = vector.broadcast %17 : vector<1x32xf32> to vector<16x32xf32>
    %172 = arith.addf %170, %171 : vector<16x32xf32>
    %cst_76 = arith.constant dense<0.000000e+00> : vector<16xf32>
    %173 = vector.multi_reduction <add>, %172, %cst_76 [1] : vector<16x32xf32> to vector<16xf32>
    %174 = vector.shape_cast %173 : vector<16xf32> to vector<16x1xf32>
    %cst_77 = arith.constant 3.200000e+01 : f32
    %175 = vector.broadcast %cst_77 : f32 to vector<16x1xf32>
    %176 = arith.divf %174, %175 : vector<16x1xf32>
    %177 = vector.broadcast %176 : vector<16x1xf32> to vector<16x32xf32>
    %178 = arith.subf %172, %177 : vector<16x32xf32>
    %179 = arith.mulf %178, %178 : vector<16x32xf32>
    %cst_78 = arith.constant dense<0.000000e+00> : vector<16xf32>
    %180 = vector.multi_reduction <add>, %179, %cst_78 [1] : vector<16x32xf32> to vector<16xf32>
    %181 = vector.shape_cast %180 : vector<16xf32> to vector<16x1xf32>
    %cst_79 = arith.constant 0.0322580636 : f32
    %182 = vector.broadcast %cst_79 : f32 to vector<16x1xf32>
    %183 = arith.mulf %181, %182 : vector<16x1xf32>
    %184 = math.sqrt %183 : vector<16x1xf32>
    %cst_80 = arith.constant 9.99999997E-7 : f32
    %185 = vector.broadcast %cst_80 : f32 to vector<16x1xf32>
    %186 = arith.addf %184, %185 : vector<16x1xf32>
    %187 = tpu.reciprocal %186 {approx = true} : vector<16x1xf32> -> vector<16x1xf32>
    %188 = vector.broadcast %176 : vector<16x1xf32> to vector<16x32xf32>
    %189 = arith.subf %172, %188 : vector<16x32xf32>
    %190 = vector.broadcast %10 : vector<1x32xf32> to vector<16x32xf32>
    %191 = arith.mulf %190, %189 : vector<16x32xf32>
    %192 = vector.broadcast %187 : vector<16x1xf32> to vector<16x32xf32>
    %193 = arith.mulf %191, %192 : vector<16x32xf32>
    %194 = vector.broadcast %11 : vector<1x32xf32> to vector<16x32xf32>
    %195 = arith.addf %193, %194 : vector<16x32xf32>
    %cst_81 = arith.constant dense<0.000000e+00> : vector<16x32xf32>
    %196 = tpu.matmul %195, %2, %cst_81 {dimension_numbers = #tpu.dot_dimension_numbers<[1], [0], [0], [1], [0, 0, 1, 1], [], []>} : vector<16x32xf32>, vector<32x32xf32>, vector<16x32xf32> -> vector<16x32xf32>
    %197 = vector.broadcast %3 : vector<1x32xf32> to vector<16x32xf32>
    %198 = arith.addf %196, %197 : vector<16x32xf32>
    %cst_82 = arith.constant dense<0.000000e+00> : vector<16x32xf32>
    %199 = tpu.matmul %195, %4, %cst_82 {dimension_numbers = #tpu.dot_dimension_numbers<[1], [0], [0], [1], [0, 0, 1, 1], [], []>} : vector<16x32xf32>, vector<32x32xf32>, vector<16x32xf32> -> vector<16x32xf32>
    %200 = vector.broadcast %5 : vector<1x32xf32> to vector<16x32xf32>
    %201 = arith.addf %199, %200 : vector<16x32xf32>
    %cst_83 = arith.constant dense<0.000000e+00> : vector<16x32xf32>
    %202 = tpu.matmul %195, %6, %cst_83 {dimension_numbers = #tpu.dot_dimension_numbers<[1], [0], [0], [1], [0, 0, 1, 1], [], []>} : vector<16x32xf32>, vector<32x32xf32>, vector<16x32xf32> -> vector<16x32xf32>
    %203 = vector.broadcast %7 : vector<1x32xf32> to vector<16x32xf32>
    %204 = arith.addf %202, %203 : vector<16x32xf32>
    %205 = vector.shape_cast %198 : vector<16x32xf32> to vector<2x8x32xf32>
    %206 = vector.shape_cast %201 : vector<16x32xf32> to vector<2x8x32xf32>
    %207 = vector.shape_cast %204 : vector<16x32xf32> to vector<2x8x32xf32>
    %208 = vector.extract_strided_slice %205 {offsets = [0, 0, 0], sizes = [2, 8, 8], strides = [1, 1, 1]} : vector<2x8x32xf32> to vector<2x8x8xf32>
    %209 = vector.extract_strided_slice %206 {offsets = [0, 0, 0], sizes = [2, 8, 8], strides = [1, 1, 1]} : vector<2x8x32xf32> to vector<2x8x8xf32>
    "tpu.trace_start"() <{level = 10 : i32, message = "bqd,bkd->bqk"}> : () -> ()
    %cst_84 = arith.constant dense<0.000000e+00> : vector<2x8x8xf32>
    %210 = tpu.matmul %208, %209, %cst_84 {dimension_numbers = #tpu.dot_dimension_numbers<[2], [2], [1], [1], [0, 0, 0, 1, 1, 1], [0], [0]>} : vector<2x8x8xf32>, vector<2x8x8xf32>, vector<2x8x8xf32> -> vector<2x8x8xf32>
    "tpu.trace_stop"() : () -> ()
    %cst_85 = arith.constant 0.353553385 : f32
    %211 = vector.broadcast %cst_85 : f32 to vector<2x8x8xf32>
    %212 = arith.mulf %210, %211 : vector<2x8x8xf32>
    %213 = vector.broadcast %23 : vector<2x1x8xf32> to vector<2x8x8xf32>
    %214 = arith.addf %212, %213 : vector<2x8x8xf32>
    %cst_86 = arith.constant dense<0xFF800000> : vector<2x8xf32>
    %215 = vector.multi_reduction <maximumf>, %214, %cst_86 [2] : vector<2x8x8xf32> to vector<2x8xf32>
    %216 = vector.shape_cast %215 : vector<2x8xf32> to vector<2x8x1xf32>
    %217 = vector.broadcast %216 : vector<2x8x1xf32> to vector<2x8x8xf32>
    %218 = arith.subf %214, %217 : vector<2x8x8xf32>
    %219 = math.exp %218 : vector<2x8x8xf32>
    %cst_87 = arith.constant dense<0.000000e+00> : vector<2x8xf32>
    %220 = vector.multi_reduction <add>, %219, %cst_87 [2] : vector<2x8x8xf32> to vector<2x8xf32>
    %221 = vector.shape_cast %220 : vector<2x8xf32> to vector<2x8x1xf32>
    %222 = tpu.reciprocal %221 {approx = true} : vector<2x8x1xf32> -> vector<2x8x1xf32>
    %223 = vector.broadcast %222 : vector<2x8x1xf32> to vector<2x8x8xf32>
    %224 = arith.mulf %219, %223 : vector<2x8x8xf32>
    %225 = vector.extract_strided_slice %207 {offsets = [0, 0, 0], sizes = [2, 8, 8], strides = [1, 1, 1]} : vector<2x8x32xf32> to vector<2x8x8xf32>
    "tpu.trace_start"() <{level = 10 : i32, message = "bqk,bkd->bqd"}> : () -> ()
    %cst_88 = arith.constant dense<0.000000e+00> : vector<2x8x8xf32>
    %226 = tpu.matmul %224, %225, %cst_88 {dimension_numbers = #tpu.dot_dimension_numbers<[2], [1], [1], [2], [0, 0, 0, 1, 1, 2], [0], [0]>} : vector<2x8x8xf32>, vector<2x8x8xf32>, vector<2x8x8xf32> -> vector<2x8x8xf32>
    "tpu.trace_stop"() : () -> ()
    %227 = vector.extract_strided_slice %205 {offsets = [0, 0, 8], sizes = [2, 8, 8], strides = [1, 1, 1]} : vector<2x8x32xf32> to vector<2x8x8xf32>
    %228 = vector.extract_strided_slice %206 {offsets = [0, 0, 8], sizes = [2, 8, 8], strides = [1, 1, 1]} : vector<2x8x32xf32> to vector<2x8x8xf32>
    "tpu.trace_start"() <{level = 10 : i32, message = "bqd,bkd->bqk"}> : () -> ()
    %cst_89 = arith.constant dense<0.000000e+00> : vector<2x8x8xf32>
    %229 = tpu.matmul %227, %228, %cst_89 {dimension_numbers = #tpu.dot_dimension_numbers<[2], [2], [1], [1], [0, 0, 0, 1, 1, 1], [0], [0]>} : vector<2x8x8xf32>, vector<2x8x8xf32>, vector<2x8x8xf32> -> vector<2x8x8xf32>
    "tpu.trace_stop"() : () -> ()
    %cst_90 = arith.constant 0.353553385 : f32
    %230 = vector.broadcast %cst_90 : f32 to vector<2x8x8xf32>
    %231 = arith.mulf %229, %230 : vector<2x8x8xf32>
    %232 = vector.broadcast %23 : vector<2x1x8xf32> to vector<2x8x8xf32>
    %233 = arith.addf %231, %232 : vector<2x8x8xf32>
    %cst_91 = arith.constant dense<0xFF800000> : vector<2x8xf32>
    %234 = vector.multi_reduction <maximumf>, %233, %cst_91 [2] : vector<2x8x8xf32> to vector<2x8xf32>
    %235 = vector.shape_cast %234 : vector<2x8xf32> to vector<2x8x1xf32>
    %236 = vector.broadcast %235 : vector<2x8x1xf32> to vector<2x8x8xf32>
    %237 = arith.subf %233, %236 : vector<2x8x8xf32>
    %238 = math.exp %237 : vector<2x8x8xf32>
    %cst_92 = arith.constant dense<0.000000e+00> : vector<2x8xf32>
    %239 = vector.multi_reduction <add>, %238, %cst_92 [2] : vector<2x8x8xf32> to vector<2x8xf32>
    %240 = vector.shape_cast %239 : vector<2x8xf32> to vector<2x8x1xf32>
    %241 = tpu.reciprocal %240 {approx = true} : vector<2x8x1xf32> -> vector<2x8x1xf32>
    %242 = vector.broadcast %241 : vector<2x8x1xf32> to vector<2x8x8xf32>
    %243 = arith.mulf %238, %242 : vector<2x8x8xf32>
    %244 = vector.extract_strided_slice %207 {offsets = [0, 0, 8], sizes = [2, 8, 8], strides = [1, 1, 1]} : vector<2x8x32xf32> to vector<2x8x8xf32>
    "tpu.trace_start"() <{level = 10 : i32, message = "bqk,bkd->bqd"}> : () -> ()
    %cst_93 = arith.constant dense<0.000000e+00> : vector<2x8x8xf32>
    %245 = tpu.matmul %243, %244, %cst_93 {dimension_numbers = #tpu.dot_dimension_numbers<[2], [1], [1], [2], [0, 0, 0, 1, 1, 2], [0], [0]>} : vector<2x8x8xf32>, vector<2x8x8xf32>, vector<2x8x8xf32> -> vector<2x8x8xf32>
    "tpu.trace_stop"() : () -> ()
    %246 = vector.extract_strided_slice %205 {offsets = [0, 0, 16], sizes = [2, 8, 8], strides = [1, 1, 1]} : vector<2x8x32xf32> to vector<2x8x8xf32>
    %247 = vector.extract_strided_slice %206 {offsets = [0, 0, 16], sizes = [2, 8, 8], strides = [1, 1, 1]} : vector<2x8x32xf32> to vector<2x8x8xf32>
    "tpu.trace_start"() <{level = 10 : i32, message = "bqd,bkd->bqk"}> : () -> ()
    %cst_94 = arith.constant dense<0.000000e+00> : vector<2x8x8xf32>
    %248 = tpu.matmul %246, %247, %cst_94 {dimension_numbers = #tpu.dot_dimension_numbers<[2], [2], [1], [1], [0, 0, 0, 1, 1, 1], [0], [0]>} : vector<2x8x8xf32>, vector<2x8x8xf32>, vector<2x8x8xf32> -> vector<2x8x8xf32>
    "tpu.trace_stop"() : () -> ()
    %cst_95 = arith.constant 0.353553385 : f32
    %249 = vector.broadcast %cst_95 : f32 to vector<2x8x8xf32>
    %250 = arith.mulf %248, %249 : vector<2x8x8xf32>
    %251 = vector.broadcast %23 : vector<2x1x8xf32> to vector<2x8x8xf32>
    %252 = arith.addf %250, %251 : vector<2x8x8xf32>
    %cst_96 = arith.constant dense<0xFF800000> : vector<2x8xf32>
    %253 = vector.multi_reduction <maximumf>, %252, %cst_96 [2] : vector<2x8x8xf32> to vector<2x8xf32>
    %254 = vector.shape_cast %253 : vector<2x8xf32> to vector<2x8x1xf32>
    %255 = vector.broadcast %254 : vector<2x8x1xf32> to vector<2x8x8xf32>
    %256 = arith.subf %252, %255 : vector<2x8x8xf32>
    %257 = math.exp %256 : vector<2x8x8xf32>
    %cst_97 = arith.constant dense<0.000000e+00> : vector<2x8xf32>
    %258 = vector.multi_reduction <add>, %257, %cst_97 [2] : vector<2x8x8xf32> to vector<2x8xf32>
    %259 = vector.shape_cast %258 : vector<2x8xf32> to vector<2x8x1xf32>
    %260 = tpu.reciprocal %259 {approx = true} : vector<2x8x1xf32> -> vector<2x8x1xf32>
    %261 = vector.broadcast %260 : vector<2x8x1xf32> to vector<2x8x8xf32>
    %262 = arith.mulf %257, %261 : vector<2x8x8xf32>
    %263 = vector.extract_strided_slice %207 {offsets = [0, 0, 16], sizes = [2, 8, 8], strides = [1, 1, 1]} : vector<2x8x32xf32> to vector<2x8x8xf32>
    "tpu.trace_start"() <{level = 10 : i32, message = "bqk,bkd->bqd"}> : () -> ()
    %cst_98 = arith.constant dense<0.000000e+00> : vector<2x8x8xf32>
    %264 = tpu.matmul %262, %263, %cst_98 {dimension_numbers = #tpu.dot_dimension_numbers<[2], [1], [1], [2], [0, 0, 0, 1, 1, 2], [0], [0]>} : vector<2x8x8xf32>, vector<2x8x8xf32>, vector<2x8x8xf32> -> vector<2x8x8xf32>
    "tpu.trace_stop"() : () -> ()
    %265 = vector.extract_strided_slice %205 {offsets = [0, 0, 24], sizes = [2, 8, 8], strides = [1, 1, 1]} : vector<2x8x32xf32> to vector<2x8x8xf32>
    %266 = vector.extract_strided_slice %206 {offsets = [0, 0, 24], sizes = [2, 8, 8], strides = [1, 1, 1]} : vector<2x8x32xf32> to vector<2x8x8xf32>
    "tpu.trace_start"() <{level = 10 : i32, message = "bqd,bkd->bqk"}> : () -> ()
    %cst_99 = arith.constant dense<0.000000e+00> : vector<2x8x8xf32>
    %267 = tpu.matmul %265, %266, %cst_99 {dimension_numbers = #tpu.dot_dimension_numbers<[2], [2], [1], [1], [0, 0, 0, 1, 1, 1], [0], [0]>} : vector<2x8x8xf32>, vector<2x8x8xf32>, vector<2x8x8xf32> -> vector<2x8x8xf32>
    "tpu.trace_stop"() : () -> ()
    %cst_100 = arith.constant 0.353553385 : f32
    %268 = vector.broadcast %cst_100 : f32 to vector<2x8x8xf32>
    %269 = arith.mulf %267, %268 : vector<2x8x8xf32>
    %270 = vector.broadcast %23 : vector<2x1x8xf32> to vector<2x8x8xf32>
    %271 = arith.addf %269, %270 : vector<2x8x8xf32>
    %cst_101 = arith.constant dense<0xFF800000> : vector<2x8xf32>
    %272 = vector.multi_reduction <maximumf>, %271, %cst_101 [2] : vector<2x8x8xf32> to vector<2x8xf32>
    %273 = vector.shape_cast %272 : vector<2x8xf32> to vector<2x8x1xf32>
    %274 = vector.broadcast %273 : vector<2x8x1xf32> to vector<2x8x8xf32>
    %275 = arith.subf %271, %274 : vector<2x8x8xf32>
    %276 = math.exp %275 : vector<2x8x8xf32>
    %cst_102 = arith.constant dense<0.000000e+00> : vector<2x8xf32>
    %277 = vector.multi_reduction <add>, %276, %cst_102 [2] : vector<2x8x8xf32> to vector<2x8xf32>
    %278 = vector.shape_cast %277 : vector<2x8xf32> to vector<2x8x1xf32>
    %279 = tpu.reciprocal %278 {approx = true} : vector<2x8x1xf32> -> vector<2x8x1xf32>
    %280 = vector.broadcast %279 : vector<2x8x1xf32> to vector<2x8x8xf32>
    %281 = arith.mulf %276, %280 : vector<2x8x8xf32>
    %282 = vector.extract_strided_slice %207 {offsets = [0, 0, 24], sizes = [2, 8, 8], strides = [1, 1, 1]} : vector<2x8x32xf32> to vector<2x8x8xf32>
    "tpu.trace_start"() <{level = 10 : i32, message = "bqk,bkd->bqd"}> : () -> ()
    %cst_103 = arith.constant dense<0.000000e+00> : vector<2x8x8xf32>
    %283 = tpu.matmul %281, %282, %cst_103 {dimension_numbers = #tpu.dot_dimension_numbers<[2], [1], [1], [2], [0, 0, 0, 1, 1, 2], [0], [0]>} : vector<2x8x8xf32>, vector<2x8x8xf32>, vector<2x8x8xf32> -> vector<2x8x8xf32>
    "tpu.trace_stop"() : () -> ()
    %284 = tpu.concatenate %226, %245, %264, %283 in 2 : vector<2x8x8xf32>, vector<2x8x8xf32>, vector<2x8x8xf32>, vector<2x8x8xf32> -> vector<2x8x32xf32>
    %285 = vector.shape_cast %284 : vector<2x8x32xf32> to vector<16x32xf32>
    %cst_104 = arith.constant dense<0.000000e+00> : vector<16x32xf32>
    %286 = tpu.matmul %285, %8, %cst_104 {dimension_numbers = #tpu.dot_dimension_numbers<[1], [0], [0], [1], [0, 0, 1, 1], [], []>} : vector<16x32xf32>, vector<32x32xf32>, vector<16x32xf32> -> vector<16x32xf32>
    %287 = arith.addf %172, %286 : vector<16x32xf32>
    %288 = vector.broadcast %9 : vector<1x32xf32> to vector<16x32xf32>
    %289 = arith.addf %287, %288 : vector<16x32xf32>
    %cst_105 = arith.constant dense<0.000000e+00> : vector<16xf32>
    %290 = vector.multi_reduction <add>, %289, %cst_105 [1] : vector<16x32xf32> to vector<16xf32>
    %291 = vector.shape_cast %290 : vector<16xf32> to vector<16x1xf32>
    %cst_106 = arith.constant 3.200000e+01 : f32
    %292 = vector.broadcast %cst_106 : f32 to vector<16x1xf32>
    %293 = arith.divf %291, %292 : vector<16x1xf32>
    %294 = vector.broadcast %293 : vector<16x1xf32> to vector<16x32xf32>
    %295 = arith.subf %289, %294 : vector<16x32xf32>
    %296 = arith.mulf %295, %295 : vector<16x32xf32>
    %cst_107 = arith.constant dense<0.000000e+00> : vector<16xf32>
    %297 = vector.multi_reduction <add>, %296, %cst_107 [1] : vector<16x32xf32> to vector<16xf32>
    %298 = vector.shape_cast %297 : vector<16xf32> to vector<16x1xf32>
    %cst_108 = arith.constant 0.0322580636 : f32
    %299 = vector.broadcast %cst_108 : f32 to vector<16x1xf32>
    %300 = arith.mulf %298, %299 : vector<16x1xf32>
    %301 = math.sqrt %300 : vector<16x1xf32>
    %cst_109 = arith.constant 9.99999997E-7 : f32
    %302 = vector.broadcast %cst_109 : f32 to vector<16x1xf32>
    %303 = arith.addf %301, %302 : vector<16x1xf32>
    %304 = tpu.reciprocal %303 {approx = true} : vector<16x1xf32> -> vector<16x1xf32>
    %305 = vector.broadcast %293 : vector<16x1xf32> to vector<16x32xf32>
    %306 = arith.subf %289, %305 : vector<16x32xf32>
    %307 = vector.broadcast %12 : vector<1x32xf32> to vector<16x32xf32>
    %308 = arith.mulf %307, %306 : vector<16x32xf32>
    %309 = vector.broadcast %304 : vector<16x1xf32> to vector<16x32xf32>
    %310 = arith.mulf %308, %309 : vector<16x32xf32>
    %311 = vector.broadcast %13 : vector<1x32xf32> to vector<16x32xf32>
    %312 = arith.addf %310, %311 : vector<16x32xf32>
    %cst_110 = arith.constant dense<0.000000e+00> : vector<16x128xf32>
    %313 = tpu.matmul %312, %14, %cst_110 {dimension_numbers = #tpu.dot_dimension_numbers<[1], [0], [0], [1], [0, 0, 1, 1], [], []>} : vector<16x32xf32>, vector<32x128xf32>, vector<16x128xf32> -> vector<16x128xf32>
    %314 = vector.broadcast %15 : vector<1x128xf32> to vector<16x128xf32>
    %315 = arith.addf %313, %314 : vector<16x128xf32>
    %cst_111 = arith.constant 0.000000e+00 : f32
    %316 = vector.broadcast %cst_111 : f32 to vector<16x128xf32>
    %317 = arith.maximumf %315, %316 : vector<16x128xf32>
    %cst_112 = arith.constant dense<0.000000e+00> : vector<16x32xf32>
    %318 = tpu.matmul %317, %16, %cst_112 {dimension_numbers = #tpu.dot_dimension_numbers<[1], [0], [0], [1], [0, 0, 1, 1], [], []>} : vector<16x128xf32>, vector<128x32xf32>, vector<16x32xf32> -> vector<16x32xf32>
    %319 = arith.addf %289, %318 : vector<16x32xf32>
    %320 = vector.broadcast %17 : vector<1x32xf32> to vector<16x32xf32>
    %321 = arith.addf %319, %320 : vector<16x32xf32>
    %c0_113 = arith.constant 0 : index
    %c0_114 = arith.constant 0 : index
    %322 = vector.load %arg18[%c0_113, %c0_114] : memref<1x32xf32, #tpu.memory_space<vmem>>, vector<1x32xf32>
    %c0_115 = arith.constant 0 : index
    %c0_116 = arith.constant 0 : index
    %323 = vector.load %arg19[%c0_115, %c0_116] : memref<1x32xf32, #tpu.memory_space<vmem>>, vector<1x32xf32>
    %cst_117 = arith.constant dense<0.000000e+00> : vector<16xf32>
    %324 = vector.multi_reduction <add>, %321, %cst_117 [1] : vector<16x32xf32> to vector<16xf32>
    %325 = vector.shape_cast %324 : vector<16xf32> to vector<16x1xf32>
    %cst_118 = arith.constant 3.200000e+01 : f32
    %326 = vector.broadcast %cst_118 : f32 to vector<16x1xf32>
    %327 = arith.divf %325, %326 : vector<16x1xf32>
    %328 = vector.broadcast %327 : vector<16x1xf32> to vector<16x32xf32>
    %329 = arith.subf %321, %328 : vector<16x32xf32>
    %330 = arith.mulf %329, %329 : vector<16x32xf32>
    %cst_119 = arith.constant dense<0.000000e+00> : vector<16xf32>
    %331 = vector.multi_reduction <add>, %330, %cst_119 [1] : vector<16x32xf32> to vector<16xf32>
    %332 = vector.shape_cast %331 : vector<16xf32> to vector<16x1xf32>
    %cst_120 = arith.constant 0.0322580636 : f32
    %333 = vector.broadcast %cst_120 : f32 to vector<16x1xf32>
    %334 = arith.mulf %332, %333 : vector<16x1xf32>
    %335 = math.sqrt %334 : vector<16x1xf32>
    %cst_121 = arith.constant 9.99999997E-7 : f32
    %336 = vector.broadcast %cst_121 : f32 to vector<16x1xf32>
    %337 = arith.addf %335, %336 : vector<16x1xf32>
    %338 = tpu.reciprocal %337 {approx = true} : vector<16x1xf32> -> vector<16x1xf32>
    %339 = vector.broadcast %327 : vector<16x1xf32> to vector<16x32xf32>
    %340 = arith.subf %321, %339 : vector<16x32xf32>
    %341 = vector.broadcast %322 : vector<1x32xf32> to vector<16x32xf32>
    %342 = arith.mulf %341, %340 : vector<16x32xf32>
    %343 = vector.broadcast %338 : vector<16x1xf32> to vector<16x32xf32>
    %344 = arith.mulf %342, %343 : vector<16x32xf32>
    %345 = vector.broadcast %323 : vector<1x32xf32> to vector<16x32xf32>
    %346 = arith.addf %344, %345 : vector<16x32xf32>
    %347 = vector.shape_cast %346 : vector<16x32xf32> to vector<2x8x32xf32>
    %c0_122 = arith.constant 0 : index
    %c0_123 = arith.constant 0 : index
    %c0_124 = arith.constant 0 : index
    %348 = vector.load %arg20[%c0_122, %c0_123, %c0_124] : memref<2x8x32xf32, #tpu.memory_space<vmem>>, vector<2x8x32xf32>
    tpu.vector_store %arg20[%c0_122, %c0_123, %c0_124], %347 {strides = array<i32>} : memref<2x8x32xf32, #tpu.memory_space<vmem>>, vector<2x8x32xf32>,
    return
  }
}

</mosaic_0001>

<bundles_post_ra>
// kernel: tpu_custom_call.1
= control target key start
LH: loop header
LB: loop body
LE: loop exit
PB: predicated region body
PF: predicated region fallthrough
CT: control target
= control target key end

     0   :  { %s5884_s0 = inlined_call_operand.hbm [shape: f32[2,8,32], index: 0, kind: input, shape index: {}]   ;;  %s5885_s1 = inlined_call_operand.hbm [shape: f32[2,1,8], index: 1, kind: input, shape index: {}]   ;;  %s5886_s2 = inlined_call_operand.vmem [shape: f32[32,32], index: 2, kind: input, shape index: {}]   ;;  %s5887_s3 = inlined_call_operand.vmem [shape: f32[1,32], index: 3, kind: input, shape index: {}]   ;;  %s5888_s4 = inlined_call_operand.vmem [shape: f32[32,32], index: 4, kind: input, shape index: {}]   ;;  %s5889_s5 = inlined_call_operand.vmem [shape: f32[1,32], index: 5, kind: input, shape index: {}]   ;;  %s5890_s6 = inlined_call_operand.vmem [shape: f32[32,32], index: 6, kind: input, shape index: {}]   ;;  %s5891_s7 = inlined_call_operand.vmem [shape: f32[1,32], index: 7, kind: input, shape index: {}]   ;;  %s5892_s8 = inlined_call_operand.vmem [shape: f32[32,32], index: 8, kind: input, shape index: {}]   ;;  %s5893_s9 = inlined_call_operand.vmem [shape: f32[1,32], index: 9, kind: input, shape index: {}]   ;;  %s5894_s10 = inlined_call_operand.vmem [shape: f32[1,32], index: 10, kind: input, shape index: {}]   ;;  %s5895_s11 = inlined_call_operand.vmem [shape: f32[1,32], index: 11, kind: input, shape index: {}]   ;;  %s5896_s12 = inlined_call_operand.vmem [shape: f32[1,32], index: 12, kind: input, shape index: {}]   ;;  %s5897_s13 = inlined_call_operand.vmem [shape: f32[1,32], index: 13, kind: input, shape index: {}]   ;;  %s5898_s14 = inlined_call_operand.vmem [shape: f32[32,128], index: 14, kind: input, shape index: {}]   ;;  %s5899_s15 = inlined_call_operand.vmem [shape: f32[1,128], index: 15, kind: input, shape index: {}]   ;;  %s5900_s16 = inlined_call_operand.vmem [shape: f32[128,32], index: 16, kind: input, shape index: {}]   ;;  %s5901_s17 = inlined_call_operand.vmem [shape: f32[1,32], index: 17, kind: input, shape index: {}]   ;;  %s5902_s18 = inlined_call_operand.vmem [shape: f32[1,32], index: 18, kind: input, shape index: {}]   ;;  %s5903_s19 = inlined_call_operand.vmem [shape: f32[1,32], index: 19, kind: input, shape index: {}]   ;;  %s5904_s20 = inlined_call_operand.hbm [shape: f32[2,8,32], index: 20, kind: output, shape index: {}]  }
   0x1   :  { %5908 = sst [smem:[#allocation11_spill]] %s5884_s0 }
   0x2   :  { %5909 = sst [smem:[#allocation12_spill]] %s5885_s1 }
   0x3   :  { %5910 = sst [smem:[#allocation13_spill]] %s5886_s2 }
   0x4   :  { %5911 = sst [smem:[#allocation14_spill]] %s5887_s3 }
   0x5   :  { %5912 = sst [smem:[#allocation15_spill]] %s5888_s4 }
   0x6   :  { %25 = vsyncpa [#allocation3], 0 }
   0x7   :  { %26 = vsyncpa [#allocation6], 0 }
   0x8   :  { %27 = vsyncpa [#allocation4], 0  ;;  %s4932_s1 = smov [#allocation2]  }
   0x9   :  { %s33_s22 = sshll.u32 %s4932_s1, 4  ;;  %s34_s22 = int_to_ptr.vmem [resolvable:$true] %s33_s22 }
   0xa   :  { %s4874_s23 = scalar_lea.vmem %s34_s22, 256  ;;  %p4879_p1 = scmp.lt.s32.totalorder %s34_s22, %s34_s22 }
   0xb   :  { %p4875_p0 = scmp.ne.s32.totalorder %s34_s22, %s4874_s23  ;;  %p4880_p2 = scmp.lt.s32.totalorder %s4874_s23, %s4874_s23 }
   0xd   :  { %p4881_p3 = por %p4880_p2, %p4879_p1 }
   0xf   :  { %p4882_p4 = pnand %p4881_p3, %p4875_p0 }
  0x11   :  { %4885 = shalt.err (!%p4882_p4)
}
  0x12   :  { %s4933_s24 = smov 128   ;;  %s4934_s2 = smov 8  }
  0x13   :  { %s5913_s26 = sld [smem:[#allocation11_spill]]  ;;  %s4935_s27 = smov [#allocation5]  }
  0x14   :  { %s45_s28 = sshll.u32 %s4935_s27, 4  ;;  %s46_s28 = int_to_ptr.vmem [resolvable:$true] %s45_s28 }
  0x15   :  { %s4894_s4 = scalar_lea.vmem %s46_s28, 32  ;;  %p4899_p6 = scmp.lt.s32.totalorder %s46_s28, %s46_s28 }
  0x16   :  { %p4895_p5 = scmp.ne.s32.totalorder %s46_s28, %s4894_s4  ;;  %p4900_p7 = scmp.lt.s32.totalorder %s4894_s4, %s4894_s4 }
  0x18   :  { %p4901_p8 = por %p4900_p7, %p4899_p6 }
  0x19   :  { %39 = dma.hbm_to_vmem [thread:$0]  %s5913_s26, 256, %s34_s22, [#allocation3], %s4933_s24, %s4933_s24, %s4934_s2  }
  0x1a   :  { %p4902_p9 = pnand %p4901_p8, %p4895_p5 }
  0x1c   :  { %4905 = shalt.err (!%p4902_p9)
}
  0x1d   :  { %s4936_s29 = smov 16   ;;  %s4937_s30 = smov 1  }
  0x1e   :  { %s5914_s1 = sld [smem:[#allocation12_spill]] }
  0x24   :  { %51 = dma.hbm_to_vmem [thread:$0]  %s5914_s1, 32, %s46_s28, [#allocation6], %s4936_s29, %s4936_s29, %s4937_s30  }
  0x25   :  { %4926 = dma.done.wait [#allocation3], 256  }
  0x26   :  { %4927 = vsyncadd [#allocation3], 4294967040 }
  0x27   :  { %4928 = dma.done.wait [#allocation6], 32  }
  0x28   :  { %4929 = vsyncadd [#allocation6], 4294967264  ;;  %vm148_vm0 = vcmask 261120   ;;  %v5061_v0 = vld [vmem:[#allocation2] sm:$0xff]  ;;  %v5063_v1 = vld [vmem:[#allocation2 + $0x8] sm:$0xff]  ;;  %s5915_s25 = sld [smem:[#allocation13_spill]] }
  0x29   :  { %v149_v2 = vsel %vm148_vm0, %v5061_v0, 0.0  ;;  %v152_v3 = vsel %vm148_vm0, %v5063_v1, 0.0  ;;  %s5916_s1 = sld [smem:[#allocation15_spill]]  ;;  %v4151_v35 = vld [vmem:[%s5894_s10] ss:$0 sm:$0xff]  ;;  %v109_v48 = vld [vmem:[%s5890_s6 + $0x18] sm:$0xff] }
  0x2a   :  { %150 = vadd.xlane.f32.xlu0 %v149_v2  ;;  %v4152_v38 = vld [vmem:[%s5895_s11] ss:$0 sm:$0xff]  ;;  %v108_v49 = vld [vmem:[%s5890_s6 + $0x10] sm:$0xff]  ;;  %v107_v50 = vld [vmem:[%s5890_s6 + $0x8] sm:$0xff]  ;;  %v4938_v52 = vmov 0.0   ;;  %vm4939_vm5 = vmmov 0  }
  0x2b   :  { %v106_v51 = vld [vmem:[%s5890_s6] sm:$0xff]  ;;  %4434 = vmatprep.subr.mxu0 %v4938_v52  ;;  %4436 = vmatprep.mubr.msk.f32.mxu0 %vm4939_vm5, %v4938_v52  ;;  %vm455_vm6 = vcmask 64512   ;;  %s5917_s22 = sld [smem:[#allocation14_spill]]  ;;  %s4940_s3 = smov 120   ;;  %vm1825_vm9 = vcmask 195584   ;;  %vm1822_vm10 = vcmask 130048  }
  0x2c   :  { %v4156_v56 = vld [vmem:[%s5889_s5] ss:$0 sm:$0xff]  ;;  %s4941_s26 = smov 112   ;;  %s4942_s27 = smov 104  }
  0x2d   :  { %v4159_v63 = vld [vmem:[%s5891_s7] ss:$0 sm:$0xff]  ;;  %s4943_s4 = smov 24  }
  0x2e   :  { %153 = vadd.xlane.f32.xlu0 %v152_v3  ;;  %v5076_v14 = vld [vmem:[%s5915_s25 + $0x18] sm:$0xff]  ;;  %v5081_v15 = vld [vmem:[%s5915_s25 + $0x10] sm:$0xff]  ;;  %v5088_v16 = vld [vmem:[%s5915_s25 + $0x8] sm:$0xff] }
  0x2f   :  { %4391 = vmatprep.subr.mxu1 %v5076_v14  ;;  %v5097_v17 = vld [vmem:[%s5915_s25] sm:$0xff]  ;;  %v5102_v18 = vld [vmem:[%s5916_s1 + $0x18] sm:$0xff]  ;;  %v103_v45 = vld [vmem:[%s5916_s1 + $0x10] sm:$0xff] }
  0x30   :  { %4392 = vmatpush3.msra.mxu1 %v5076_v14  ;;  %v102_v46 = vld [vmem:[%s5916_s1 + $0x8] sm:$0xff]  ;;  %v101_v47 = vld [vmem:[%s5916_s1] sm:$0xff] }
  0x31   :  { %4393 = vmatprep.subr.mxu1 %v5081_v15  ;;  %v4153_v59 = vld [vmem:[%s5917_s22] ss:$0 sm:$0xff] }
  0x32   :  { %4394 = vmatpush3.msra.mxu1 %v5081_v15 }
  0x33   :  { %4395 = vmatprep.subr.mxu1 %v5088_v16 }
  0x34   :  { %4396 = vmatpush3.msra.mxu1 %v5088_v16 }
  0x35   :  { %4397 = vmatprep.subr.mxu1 %v5097_v17 }
  0x36   :  { %4398 = vmatpush3.msra.mxu1 %v5097_v17 }
  0x37   :  { %4402 = vmatprep.subr.mxu1 %v5102_v18 }
  0xb3   :  { %v151_v4 = vpop.xlane.xlu0 %150 }
  0xb4   :  { %v156_v5 = vmul.f32 0.03125, %v151_v4 }
  0xb6   :  { %v158_v6 = vsub.f32 %v5061_v0, %v156_v5 }
  0xb7   :  { %v154_v7 = vpop.xlane.xlu0 %153 }
  0xb8   :  { %v157_v8 = vmul.f32 0.03125, %v154_v7  ;;  %v160_v9 = vmul.f32 %v158_v6, %v158_v6  ;;  %v194_v36 = vmul.f32 %v4151_v35, %v158_v6  ;;  %v612_v6 = vlaneseq  ;;  %v142_v7 = vld [vmem:[#allocation5] sm:$0x1] }
  0xb9   :  { %vm144_vm7 = vcmp.eq.f32.partialorder %v142_v7, 0.0 }
  0xba   :  { %v159_v10 = vsub.f32 %v5063_v1, %v157_v8  ;;  %v162_v11 = vsel %vm148_vm0, %v160_v9, 0.0  ;;  %v613_v8 = vshrl.u32 %v612_v6, 7  ;;  %v143_v9 = vld [vmem:[#allocation5 + $0x1] sm:$0x1] }
  0xbb   :  { %163 = vadd.xlane.f32.xlu1 %v162_v11  ;;  %v146_v11 = vsel %vm144_vm7, -1e+09, %v4938_v52  ;;  %vm145_vm8 = vcmp.eq.f32.partialorder %v143_v9, 0.0 }
  0xbc   :  { %v161_v12 = vmul.f32 %v159_v10, %v159_v10  ;;  %v195_v40 = vmul.f32 %v4151_v35, %v159_v10  ;;  %v614_v10 = vsub.s32 0, %v613_v8 }
  0xbe   :  { %v165_v13 = vsel %vm148_vm0, %v161_v12, 0.0  ;;  %v5187_v12 = vrot.slane %v146_v11, %v614_v10 }
  0xbf   :  { %166 = vadd.xlane.f32.xlu1 %v165_v13 }
 0x144   :  { %v164_v19 = vpop.xlane.xlu1 %163 }
 0x145   :  { %v168_v20 = vmul.f32 0.032258064, %v164_v19  ;;  %v147_v19 = vsel %vm145_vm8, -1e+09, %v4938_v52 }
 0x147   :  { %4744 = vrsqrt.f32 %v168_v20  ;;  %vm172_vm1 = vcmp.eq.f32.partialorder %v168_v20, inf  ;;  %v175_v25 = vand.u32 2147483648, %v168_v20  ;;  %vm174_vm2 = vcmp.eq.f32.partialorder %v168_v20, 0.0 }
 0x148   :  { %v167_v21 = vpop.xlane.xlu1 %166 }
 0x149   :  { %v169_v22 = vmul.f32 0.032258064, %v167_v21 }
 0x14b   :  { %4746 = vrsqrt.f32 %v169_v22  ;;  %vm179_vm3 = vcmp.eq.f32.partialorder %v169_v22, inf  ;;  %v182_v31 = vand.u32 2147483648, %v169_v22  ;;  %vm181_vm4 = vcmp.eq.f32.partialorder %v169_v22, 0.0 }
 0x154   :  { %v4745_v23 = vpop.eup %4744 }
 0x155   :  { %v171_v24 = vmul.f32 %v4745_v23, %v168_v20  ;;  %v5191_v23 = vrot.slane %v147_v19, %v614_v10 }
 0x157   :  { %v173_v26 = vsel %vm172_vm1, %v168_v20, %v171_v24 }
 0x158   :  { %v4747_v27 = vpop.eup %4746  ;;  %v176_v28 = vsel %vm174_vm2, %v175_v25, %v173_v26 }
 0x159   :  { %v178_v29 = vmul.f32 %v4747_v27, %v169_v22  ;;  %v184_v30 = vadd.f32 1e-06, %v176_v28 }
 0x15b   :  { %v180_v32 = vsel %vm179_vm3, %v169_v22, %v178_v29  ;;  %4748 = vrcp.f32 %v184_v30 }
 0x15c   :  { %v183_v33 = vsel %vm181_vm4, %v182_v31, %v180_v32 }
 0x15d   :  { %v185_v34 = vadd.f32 1e-06, %v183_v33 }
 0x15f   :  { %4750 = vrcp.f32 %v185_v34 }
 0x168   :  { %v4749_v37 = vpop.eup %4748 }
 0x169   :  { %v196_v39 = vmul.f32 %v4749_v37, %v194_v36 }
 0x16b   :  { %v204_v41 = vadd.f32 %v4152_v38, %v196_v39 }
 0x16c   :  { %v4751_v42 = vpop.eup %4750 }
 0x16d   :  { %4399 = vmatprep.mubr.msk.f32.mxu1 %vm148_vm0, %v204_v41  ;;  %v197_v43 = vmul.f32 %v4751_v42, %v195_v40 }
 0x16f   :  { %v205_v44 = vadd.f32 %v4152_v38, %v197_v43 }
 0x171   :  { %4400 = vmatmul.mubr.msk.f32.vlgmr.msra.gmra.mxu1 %vm148_vm0, %v205_v44 }
 0x172   :  { %4403 = vmatpush3.msra.mxu1 %v5102_v18  ;;  %4410 = vmatprep.mubr.msk.f32.mxu1 %vm148_vm0, %v204_v41 }
 0x173   :  { %4404 = vmatprep.subr.mxu1 %v103_v45 }
 0x174   :  { %4405 = vmatpush3.msra.mxu1 %v103_v45 }
 0x175   :  { %4406 = vmatprep.subr.mxu1 %v102_v46 }
 0x176   :  { %4407 = vmatpush3.msra.mxu1 %v102_v46 }
 0x177   :  { %4408 = vmatprep.subr.mxu1 %v101_v47 }
 0x178   :  { %4409 = vmatpush3.msra.mxu1 %v101_v47 }
 0x179   :  { %4411 = vmatmul.mubr.msk.f32.vlgmr.msra.gmra.mxu1 %vm148_vm0, %v205_v44  ;;  %4413 = vmatprep.subr.mxu1 %v109_v48 }
 0x17a   :  { %4414 = vmatpush3.msra.mxu1 %v109_v48  ;;  %4421 = vmatprep.mubr.msk.f32.mxu1 %vm148_vm0, %v204_v41 }
 0x17b   :  { %4415 = vmatprep.subr.mxu1 %v108_v49 }
 0x17c   :  { %4416 = vmatpush3.msra.mxu1 %v108_v49 }
 0x17d   :  { %4417 = vmatprep.subr.mxu1 %v107_v50 }
 0x17e   :  { %4418 = vmatpush3.msra.mxu1 %v107_v50 }
 0x17f   :  { %4419 = vmatprep.subr.mxu1 %v106_v51 }
 0x180   :  { %4420 = vmatpush3.msra.mxu1 %v106_v51 }
 0x181   :  { %4422 = vmatmul.mubr.msk.f32.vlgmr.msra.gmra.mxu1 %vm148_vm0, %v205_v44  ;;  %4424 = vmatprep.subr.mxu1 %v4938_v52 }
 0x182   :  { %4426 = vmatprep.mubr.msk.f32.mxu1 %vm4939_vm5, %v4938_v52 }
 0x231   :  { %v4401_v53 = vpop.f32.mrf.mxu1 }
 0x232   :  { %v5171_v2 = vadd.f32 %v4401_v53, %v4153_v59 }
 0x233   :  { %v284_v54 = vpop.f32.mrf.mxu1 }
 0x234   :  { %v5157_v60 = vadd.f32 %v4153_v59, %v284_v54 }
 0x239   :  { %v4412_v55 = vpop.f32.mrf.mxu1 }
 0x23a   :  { %v5160_v61 = vadd.f32 %v4412_v55, %v4156_v56 }
 0x23b   :  { %v365_v57 = vpop.f32.mrf.mxu1 }
 0x23c   :  { %v5150_v58 = vadd.f32 %v4156_v56, %v365_v57 }
 0x23e   :  { %4425 = vmatpush3.xpose.msk.msra.mxu1 %vm455_vm6, %v5150_v58 }
 0x23f   :  { %4429 = vmatprep.subr.mxu1 %v4938_v52 }
 0x241   :  { %v4423_v62 = vpop.f32.mrf.mxu1  ;;  %4427 = vmatmul.mubr.msk.f32.vlgmr.msra.gmra.mxu1 %vm455_vm6, %v5157_v60 }
 0x242   :  { %4430 = vmatpush3.xpose.msk.msra.mxu1 %vm455_vm6, %v5160_v61  ;;  %4431 = vmatprep.mubr.msk.f32.mxu1 %vm4939_vm5, %v4938_v52  ;;  %v5174_v4 = vadd.f32 %v4423_v62, %v4159_v63 }
 0x243   :  { %v446_v3 = vpop.f32.mrf.mxu1  ;;  %4439 = vmatprep.subr.mxu1 %v4938_v52 }
 0x244   :  { %v5176_v5 = vadd.f32 %v4159_v63, %v446_v3 }
 0x245   :  { %4432 = vmatmul.mubr.msk.f32.vlgmr.msra.gmra.mxu1 %vm455_vm6, %v5171_v2 }
 0x246   :  { %4435 = vmatpush3.msra.mxu0 %v5176_v5  ;;  %4440 = vmatpush3.msra.mxu1 %v5174_v4 }
 0x247   :  { %4444 = vmatprep.subr.mxu0 %v4938_v52  ;;  %4441 = vmatprep.mubr.msk.f32.mxu1 %vm4939_vm5, %v4938_v52 }
 0x248   :  { %4449 = vmatprep.subr.mxu1 %v4938_v52 }
 0x301   :  { %v528_v13 = vpop.f32.mrf.mxu1 }
 0x302   :  { %v608_v20 = vmul.f32 0.35355338, %v528_v13 }
 0x303   :  { %v4428_v21 = vpop.f32.mrf.mxu1 }
 0x304   :  { %v622_v22 = vadd.f32 %v5187_v12, %v608_v20 }
 0x305   :  { %v604_v24 = vpop.f32.mrf.mxu1 }
 0x306   :  { %v609_v25 = vmul.f32 0.35355338, %v604_v24  ;;  %v624_v26 = vsel %vm455_vm6, %v622_v22, -inf }
 0x307   :  { %625 = vmax.xlane.f32.xlu0 %v624_v26  ;;  %v4433_v27 = vpop.f32.mrf.mxu1 }
 0x308   :  { %v623_v28 = vadd.f32 %v5191_v23, %v609_v25 }
 0x30a   :  { %v627_v29 = vsel %vm455_vm6, %v623_v28, -inf }
 0x30b   :  { %628 = vmax.xlane.f32.xlu1 %v627_v29 }
 0x31c   :  { %872 = vrot.lane.b32.xlu1 %v5160_v61, %s4940_s3 }
 0x320   :  { %792 = vrot.lane.b32.xlu1 %v5157_v60, %s4940_s3 }
 0x390   :  { %v626_v30 = vpop.xlane.xlu0 %625 }
 0x391   :  { %v630_v31 = vsub.f32 %v622_v22, %v626_v30 }
 0x393   :  { %v632_v32 = vmul.f32 1.442695, %v630_v31 }
 0x394   :  { %v629_v33 = vpop.xlane.xlu1 %628 }
 0x395   :  { %4752 = vpow2.f32 %v632_v32  ;;  %v631_v34 = vsub.f32 %v623_v28, %v629_v33 }
 0x397   :  { %v634_v35 = vmul.f32 1.442695, %v631_v34 }
 0x398   :  { %v873_v40 = vpop.permute.xlu1 %872 }
 0x399   :  { %4754 = vpow2.f32 %v634_v35 }
 0x39c   :  { %v793_v41 = vpop.permute.xlu1 %792 }
 0x3a2   :  { %v4753_v36 = vpop.eup %4752 }
 0x3a3   :  { %v636_v37 = vsel %vm455_vm6, %v4753_v36, 0.0 }
 0x3a4   :  { %637 = vadd.xlane.f32.xlu0 %v636_v37 }
 0x3a6   :  { %v4755_v38 = vpop.eup %4754 }
 0x3a7   :  { %v639_v39 = vsel %vm455_vm6, %v4755_v38, 0.0 }
 0x3a8   :  { %640 = vadd.xlane.f32.xlu1 %v639_v39 }
 0x3b9   :  { %870 = vrot.lane.b32.xlu1 %v5171_v2, %s4940_s3 }
 0x3ba   :  { %794 = vrot.lane.b32.xlu0 %v5150_v58, %s4940_s3 }
 0x42d   :  { %v638_v42 = vpop.xlane.xlu0 %637 }
 0x42e   :  { %4756 = vrcp.f32 %v638_v42 }
 0x431   :  { %v641_v43 = vpop.xlane.xlu1 %640  ;;  %v795_v46 = vpop.permute.xlu0 %794 }
 0x432   :  { %4758 = vrcp.f32 %v641_v43 }
 0x435   :  { %v871_v49 = vpop.permute.xlu1 %870 }
 0x43b   :  { %v4757_v44 = vpop.eup %4756 }
 0x43c   :  { %v644_v45 = vmul.f32 %v4757_v44, %v4753_v36 }
 0x43e   :  { %4437 = vmatmul.mubr.msk.f32.vlgmr.msra.gmra.mxu0 %vm455_vm6, %v644_v45 }
 0x43f   :  { %v4759_v47 = vpop.eup %4758  ;;  %4445 = vmatpush3.xpose.msk.msra.mxu0 %vm455_vm6, %v795_v46  ;;  %4446 = vmatprep.mubr.msk.f32.mxu0 %vm4939_vm5, %v4938_v52 }
 0x440   :  { %v645_v48 = vmul.f32 %v4759_v47, %v4755_v38  ;;  %4454 = vmatprep.subr.mxu0 %v4938_v52 }
 0x442   :  { %4442 = vmatmul.mubr.msk.f32.vlgmr.msra.gmra.mxu1 %vm455_vm6, %v645_v48  ;;  %4447 = vmatmul.mubr.msk.f32.vlgmr.msra.gmra.mxu0 %vm455_vm6, %v793_v41 }
 0x443   :  { %4450 = vmatpush3.xpose.msk.msra.mxu1 %vm455_vm6, %v873_v40  ;;  %4451 = vmatprep.mubr.msk.f32.mxu1 %vm4939_vm5, %v4938_v52 }
 0x444   :  { %4459 = vmatprep.subr.mxu1 %v4938_v52  ;;  %4456 = vmatprep.mubr.msk.f32.mxu0 %vm4939_vm5, %v4938_v52 }
 0x446   :  { %4452 = vmatmul.mubr.msk.f32.vlgmr.msra.gmra.mxu1 %vm455_vm6, %v871_v49 }
 0x447   :  { %4461 = vmatprep.mubr.msk.f32.mxu1 %vm4939_vm5, %v4938_v52 }
 0x4fe   :  { %v5222_v50 = vpop.f32.mrf.mxu0 }
 0x500   :  { %v4438_v51 = vpop.f32.mrf.mxu0 }
 0x502   :  { %v5224_v53 = vpop.f32.mrf.mxu1  ;;  %v866_v54 = vpop.f32.mrf.mxu0 }
 0x503   :  { %v948_v55 = vmul.f32 0.35355338, %v866_v54 }
 0x504   :  { %v4443_v56 = vpop.f32.mrf.mxu1  ;;  %v4448_v57 = vpop.f32.mrf.mxu0 }
 0x505   :  { %v950_v59 = vadd.f32 %v948_v55, %v5187_v12 }
 0x506   :  { %v944_v62 = vpop.f32.mrf.mxu1 }
 0x507   :  { %v949_v63 = vmul.f32 0.35355338, %v944_v62  ;;  %v952_v3 = vsel %vm455_vm6, %v950_v59, -inf }
 0x508   :  { %953 = vmax.xlane.f32.xlu0 %v952_v3  ;;  %v4453_v6 = vpop.f32.mrf.mxu1 }
 0x509   :  { %v951_v7 = vadd.f32 %v949_v63, %v5191_v23 }
 0x50b   :  { %v955_v8 = vsel %vm455_vm6, %v951_v7, -inf }
 0x50c   :  { %956 = vmax.xlane.f32.xlu1 %v955_v8 }
 0x51d   :  { %1052 = vrot.lane.b32.xlu1 %v5174_v4, %s4940_s3 }
 0x51e   :  { %975 = vrot.lane.b32.xlu0 %v5176_v5, %s4940_s3 }
 0x521   :  { %1130 = vrot.lane.b32.xlu1 %v5150_v58, %s4941_s26 }
 0x525   :  { %1208 = vrot.lane.b32.xlu1 %v5160_v61, %s4941_s26 }
 0x529   :  { %1206 = vrot.lane.b32.xlu1 %v5171_v2, %s4941_s26 }
 0x591   :  { %v954_v9 = vpop.xlane.xlu0 %953 }
 0x592   :  { %v958_v10 = vsub.f32 %v950_v59, %v954_v9 }
 0x594   :  { %v960_v11 = vmul.f32 1.442695, %v958_v10 }
 0x595   :  { %v976_v13 = vpop.permute.xlu0 %975  ;;  %v957_v19 = vpop.xlane.xlu1 %956 }
 0x596   :  { %4760 = vpow2.f32 %v960_v11  ;;  %v959_v20 = vsub.f32 %v951_v7, %v957_v19  ;;  %4455 = vmatpush3.msra.mxu0 %v976_v13 }
 0x597   :  { %4464 = vmatprep.subr.mxu0 %v4938_v52 }
 0x598   :  { %v962_v21 = vmul.f32 1.442695, %v959_v20 }
 0x599   :  { %v1053_v22 = vpop.permute.xlu1 %1052 }
 0x59a   :  { %4762 = vpow2.f32 %v962_v21  ;;  %4460 = vmatpush3.msra.mxu1 %v1053_v22 }
 0x59b   :  { %4469 = vmatprep.subr.mxu1 %v4938_v52 }
 0x59d   :  { %v1131_v30 = vpop.permute.xlu1 %1130 }
 0x5a1   :  { %v1209_v34 = vpop.permute.xlu1 %1208 }
 0x5a3   :  { %v4761_v24 = vpop.eup %4760 }
 0x5a4   :  { %v964_v25 = vsel %vm455_vm6, %v4761_v24, 0.0 }
 0x5a5   :  { %965 = vadd.xlane.f32.xlu0 %v964_v25  ;;  %v1207_v37 = vpop.permute.xlu1 %1206 }
 0x5a7   :  { %v4763_v26 = vpop.eup %4762 }
 0x5a8   :  { %v967_v27 = vsel %vm455_vm6, %v4763_v26, 0.0 }
 0x5a9   :  { %968 = vadd.xlane.f32.xlu0 %v967_v27 }
 0x5bf   :  { %1128 = vrot.lane.b32.xlu0 %v5157_v60, %s4941_s26 }
 0x62e   :  { %v966_v28 = vpop.xlane.xlu0 %965 }
 0x62f   :  { %4764 = vrcp.f32 %v966_v28 }
 0x632   :  { %v969_v29 = vpop.xlane.xlu0 %968 }
 0x633   :  { %4766 = vrcp.f32 %v969_v29 }
 0x636   :  { %v1129_v36 = vpop.permute.xlu0 %1128 }
 0x63c   :  { %v4765_v31 = vpop.eup %4764 }
 0x63d   :  { %v972_v32 = vmul.f32 %v4765_v31, %v4761_v24 }
 0x63f   :  { %4457 = vmatmul.mubr.msk.f32.vlgmr.msra.gmra.mxu0 %vm455_vm6, %v972_v32 }
 0x640   :  { %v4767_v33 = vpop.eup %4766  ;;  %4465 = vmatpush3.xpose.msk.msra.mxu0 %vm455_vm6, %v1131_v30  ;;  %4466 = vmatprep.mubr.msk.f32.mxu0 %vm4939_vm5, %v4938_v52 }
 0x641   :  { %v973_v35 = vmul.f32 %v4767_v33, %v4763_v26  ;;  %4474 = vmatprep.subr.mxu0 %v4938_v52 }
 0x643   :  { %4462 = vmatmul.mubr.msk.f32.vlgmr.msra.gmra.mxu1 %vm455_vm6, %v973_v35  ;;  %4467 = vmatmul.mubr.msk.f32.vlgmr.msra.gmra.mxu0 %vm455_vm6, %v1129_v36 }
 0x644   :  { %4470 = vmatpush3.xpose.msk.msra.mxu1 %vm455_vm6, %v1209_v34  ;;  %4471 = vmatprep.mubr.msk.f32.mxu1 %vm4939_vm5, %v4938_v52 }
 0x645   :  { %4479 = vmatprep.subr.mxu1 %v4938_v52  ;;  %4476 = vmatprep.mubr.msk.f32.mxu0 %vm4939_vm5, %v4938_v52 }
 0x647   :  { %4472 = vmatmul.mubr.msk.f32.vlgmr.msra.gmra.mxu1 %vm455_vm6, %v1207_v37 }
 0x648   :  { %4481 = vmatprep.mubr.msk.f32.mxu1 %vm4939_vm5, %v4938_v52 }
 0x6ff   :  { %v5262_v38 = vpop.f32.mrf.mxu0 }
 0x701   :  { %v4458_v39 = vpop.f32.mrf.mxu0 }
 0x703   :  { %v5264_v40 = vpop.f32.mrf.mxu1  ;;  %v1202_v41 = vpop.f32.mrf.mxu0 }
 0x704   :  { %v1284_v42 = vmul.f32 0.35355338, %v1202_v41 }
 0x705   :  { %v4463_v43 = vpop.f32.mrf.mxu1  ;;  %v4468_v44 = vpop.f32.mrf.mxu0 }
 0x706   :  { %v1286_v45 = vadd.f32 %v1284_v42, %v5187_v12 }
 0x707   :  { %v1280_v46 = vpop.f32.mrf.mxu1 }
 0x708   :  { %v1285_v47 = vmul.f32 0.35355338, %v1280_v46  ;;  %v1288_v48 = vsel %vm455_vm6, %v1286_v45, -inf }
 0x709   :  { %1289 = vmax.xlane.f32.xlu0 %v1288_v48  ;;  %v4473_v49 = vpop.f32.mrf.mxu1 }
 0x70a   :  { %v1287_v51 = vadd.f32 %v1285_v47, %v5191_v23 }
 0x70c   :  { %v1291_v54 = vsel %vm455_vm6, %v1287_v51, -inf }
 0x70d   :  { %1292 = vmax.xlane.f32.xlu1 %v1291_v54 }
 0x71e   :  { %1386 = vrot.lane.b32.xlu1 %v5174_v4, %s4941_s26 }
 0x71f   :  { %1310 = vrot.lane.b32.xlu0 %v5176_v5, %s4941_s26 }
 0x722   :  { %1464 = vrot.lane.b32.xlu1 %v5150_v58, %s4942_s27 }
 0x726   :  { %1542 = vrot.lane.b32.xlu1 %v5160_v61, %s4942_s27 }
 0x72a   :  { %1540 = vrot.lane.b32.xlu1 %v5171_v2, %s4942_s27 }
 0x792   :  { %v1290_v55 = vpop.xlane.xlu0 %1289 }
 0x793   :  { %v1294_v56 = vsub.f32 %v1286_v45, %v1290_v55 }
 0x795   :  { %v1296_v57 = vmul.f32 1.442695, %v1294_v56 }
 0x796   :  { %v1311_v59 = vpop.permute.xlu0 %1310  ;;  %v1293_v62 = vpop.xlane.xlu1 %1292 }
 0x797   :  { %4768 = vpow2.f32 %v1296_v57  ;;  %v1295_v63 = vsub.f32 %v1287_v51, %v1293_v62  ;;  %4475 = vmatpush3.msra.mxu0 %v1311_v59  ;;  %v113_v59 = vld [vmem:[%s5892_s8 + $0x10] sm:$0xff]  ;;  %v5333_v62 = vld [vmem:[%s5892_s8 + $0x8] sm:$0xff] }
 0x798   :  { %4484 = vmatprep.subr.mxu0 %v4938_v52 }
 0x799   :  { %v1298_v3 = vmul.f32 1.442695, %v1295_v63  ;;  %v111_v63 = vld [vmem:[%s5892_s8] sm:$0xff] }
 0x79a   :  { %v1387_v6 = vpop.permute.xlu1 %1386 }
 0x79b   :  { %4770 = vpow2.f32 %v1298_v3  ;;  %4480 = vmatpush3.msra.mxu1 %v1387_v6 }
 0x79c   :  { %4489 = vmatprep.subr.mxu1 %v4938_v52 }
 0x79e   :  { %v1465_v10 = vpop.permute.xlu1 %1464 }
 0x7a2   :  { %v1543_v20 = vpop.permute.xlu1 %1542 }
 0x7a4   :  { %v4769_v58 = vpop.eup %4768 }
 0x7a5   :  { %v1300_v61 = vsel %vm455_vm6, %v4769_v58, 0.0 }
 0x7a6   :  { %1301 = vadd.xlane.f32.xlu0 %v1300_v61  ;;  %v1541_v22 = vpop.permute.xlu1 %1540 }
 0x7a8   :  { %v4771_v2 = vpop.eup %4770 }
 0x7a9   :  { %v1303_v7 = vsel %vm455_vm6, %v4771_v2, 0.0 }
 0x7aa   :  { %1304 = vadd.xlane.f32.xlu0 %v1303_v7 }
 0x7c0   :  { %1462 = vrot.lane.b32.xlu0 %v5157_v60, %s4942_s27 }
 0x82f   :  { %v1302_v8 = vpop.xlane.xlu0 %1301 }
 0x830   :  { %4772 = vrcp.f32 %v1302_v8 }
 0x833   :  { %v1305_v9 = vpop.xlane.xlu0 %1304 }
 0x834   :  { %4774 = vrcp.f32 %v1305_v9 }
 0x837   :  { %v1463_v60 = vpop.permute.xlu0 %1462 }
 0x83d   :  { %v4773_v11 = vpop.eup %4772 }
 0x83e   :  { %v1308_v13 = vmul.f32 %v4773_v11, %v4769_v58 }
 0x840   :  { %4477 = vmatmul.mubr.msk.f32.vlgmr.msra.gmra.mxu0 %vm455_vm6, %v1308_v13 }
 0x841   :  { %v4775_v19 = vpop.eup %4774  ;;  %4485 = vmatpush3.xpose.msk.msra.mxu0 %vm455_vm6, %v1465_v10  ;;  %4486 = vmatprep.mubr.msk.f32.mxu0 %vm4939_vm5, %v4938_v52 }
 0x842   :  { %v1309_v21 = vmul.f32 %v4775_v19, %v4771_v2  ;;  %4494 = vmatprep.subr.mxu0 %v4938_v52 }
 0x844   :  { %4482 = vmatmul.mubr.msk.f32.vlgmr.msra.gmra.mxu1 %vm455_vm6, %v1309_v21  ;;  %4487 = vmatmul.mubr.msk.f32.vlgmr.msra.gmra.mxu0 %vm455_vm6, %v1463_v60 }
 0x845   :  { %4490 = vmatpush3.xpose.msk.msra.mxu1 %vm455_vm6, %v1543_v20  ;;  %4491 = vmatprep.mubr.msk.f32.mxu1 %vm4939_vm5, %v4938_v52 }
 0x846   :  { %4499 = vmatprep.subr.mxu1 %v4938_v52  ;;  %4496 = vmatprep.mubr.msk.f32.mxu0 %vm4939_vm5, %v4938_v52 }
 0x848   :  { %4492 = vmatmul.mubr.msk.f32.vlgmr.msra.gmra.mxu1 %vm455_vm6, %v1541_v22 }
 0x849   :  { %4501 = vmatprep.mubr.msk.f32.mxu1 %vm4939_vm5, %v4938_v52 }
 0x900   :  { %v1382_v24 = vpop.f32.mrf.mxu0 }
 0x902   :  { %v4478_v25 = vpop.f32.mrf.mxu0 }
 0x904   :  { %v1458_v26 = vpop.f32.mrf.mxu1  ;;  %v1536_v27 = vpop.f32.mrf.mxu0 }
 0x905   :  { %v1618_v28 = vmul.f32 0.35355338, %v1536_v27 }
 0x906   :  { %v4483_v29 = vpop.f32.mrf.mxu1  ;;  %v4488_v30 = vpop.f32.mrf.mxu0 }
 0x907   :  { %v1620_v31 = vadd.f32 %v1618_v28, %v5187_v12 }
 0x908   :  { %v1614_v32 = vpop.f32.mrf.mxu1 }
 0x909   :  { %v1619_v33 = vmul.f32 0.35355338, %v1614_v32  ;;  %v1622_v34 = vsel %vm455_vm6, %v1620_v31, -inf }
 0x90a   :  { %1623 = vmax.xlane.f32.xlu0 %v1622_v34  ;;  %v4493_v35 = vpop.f32.mrf.mxu1 }
 0x90b   :  { %v1621_v36 = vadd.f32 %v1619_v33, %v5191_v23 }
 0x90d   :  { %v1625_v37 = vsel %vm455_vm6, %v1621_v36, -inf }
 0x90e   :  { %1626 = vmax.xlane.f32.xlu1 %v1625_v37 }
 0x91f   :  { %1720 = vrot.lane.b32.xlu1 %v5174_v4, %s4942_s27 }
 0x923   :  { %1798 = vrot.lane.b32.xlu1 %v5262_v38, %s4934_s2 }
 0x927   :  { %1800 = vrot.lane.b32.xlu1 %v5264_v40, %s4934_s2 }
 0x92b   :  { %1808 = vrot.lane.b32.xlu1 %v1458_v26, %s4936_s29 }
 0x993   :  { %v1624_v39 = vpop.xlane.xlu0 %1623 }
 0x994   :  { %v1628_v41 = vsub.f32 %v1620_v31, %v1624_v39 }
 0x996   :  { %v1630_v42 = vmul.f32 1.442695, %v1628_v41  ;;  %v5380_v41 = vld [vmem:[%s5898_s14 + $0x18] sm:$0xff] }
 0x997   :  { %v1627_v43 = vpop.xlane.xlu1 %1626 }
 0x998   :  { %4776 = vpow2.f32 %v1630_v42  ;;  %v1629_v44 = vsub.f32 %v1621_v36, %v1627_v43  ;;  %v5385_v42 = vld [vmem:[%s5898_s14 + $0x10] sm:$0xff]  ;;  %v5392_v43 = vld [vmem:[%s5898_s14 + $0x8] sm:$0xff] }
 0x99a   :  { %v1632_v45 = vmul.f32 1.442695, %v1629_v44  ;;  %v5401_v44 = vld [vmem:[%s5898_s14] sm:$0xff] }
 0x99b   :  { %v1721_v46 = vpop.permute.xlu1 %1720 }
 0x99c   :  { %4778 = vpow2.f32 %v1632_v45  ;;  %4500 = vmatpush3.msra.mxu1 %v1721_v46  ;;  %v5409_v45 = vld [vmem:[%s5900_s16 + $0x78] sm:$0xff]  ;;  %v5414_v46 = vld [vmem:[%s5900_s16 + $0x70] sm:$0xff] }
 0x99d   :  { %4515 = vmatprep.subr.mxu1 %v5380_v41 }
 0x99f   :  { %v1799_v2 = vpop.permute.xlu1 %1798 }
 0x9a0   :  { %v1820_v9 = vsel %vm455_vm6, %v5222_v50, %v1799_v2  ;;  %v4188_v50 = vld [vmem:[%s5893_s9] ss:$0 sm:$0xff] }
 0x9a3   :  { %v1801_v7 = vpop.permute.xlu1 %1800 }
 0x9a4   :  { %v1821_v20 = vsel %vm455_vm6, %v5224_v53, %v1801_v7 }
 0x9a5   :  { %v4777_v47 = vpop.eup %4776 }
 0x9a6   :  { %v1634_v4 = vsel %vm455_vm6, %v4777_v47, 0.0 }
 0x9a7   :  { %1635 = vadd.xlane.f32.xlu0 %v1634_v4  ;;  %v1809_v10 = vpop.permute.xlu1 %1808  ;;  %v5428_v4 = vld [vmem:[%s5900_s16 + $0x60] sm:$0xff] }
 0x9a8   :  { %v1824_v21 = vsel %vm1822_vm10, %v1821_v20, %v1809_v10 }
 0x9a9   :  { %v4779_v38 = vpop.eup %4778 }
 0x9aa   :  { %v1637_v48 = vsel %vm455_vm6, %v4779_v38, 0.0 }
 0x9ab   :  { %1638 = vadd.xlane.f32.xlu0 %v1637_v48  ;;  %v5442_v48 = vld [vmem:[%s5900_s16 + $0x50] sm:$0xff] }
 0x9c1   :  { %1644 = vrot.lane.b32.xlu0 %v5176_v5, %s4942_s27  ;;  %v5323_v5 = vld [vmem:[%s5892_s8 + $0x18] sm:$0xff] }
 0x9c5   :  { %1806 = vrot.lane.b32.xlu0 %v1382_v24, %s4936_s29 }
 0xa30   :  { %v1636_v40 = vpop.xlane.xlu0 %1635 }
 0xa31   :  { %4780 = vrcp.f32 %v1636_v40  ;;  %v5449_v40 = vld [vmem:[%s5900_s16 + $0x48] sm:$0xff] }
 0xa34   :  { %v1639_v49 = vpop.xlane.xlu0 %1638 }
 0xa35   :  { %4782 = vrcp.f32 %v1639_v49  ;;  %v5456_v49 = vld [vmem:[%s5900_s16 + $0x40] sm:$0xff] }
 0xa38   :  { %v1645_v51 = vpop.permute.xlu0 %1644 }
 0xa39   :  { %4495 = vmatpush3.msra.mxu0 %v1645_v51  ;;  %v5463_v51 = vld [vmem:[%s5900_s16 + $0x38] sm:$0xff] }
 0xa3a   :  { %4504 = vmatprep.subr.mxu0 %v5323_v5 }
 0xa3c   :  { %v1807_v8 = vpop.permute.xlu0 %1806 }
 0xa3d   :  { %v1823_v11 = vsel %vm1822_vm10, %v1820_v9, %v1807_v8 }
 0xa3e   :  { %v4781_v54 = vpop.eup %4780 }
 0xa3f   :  { %v1642_v55 = vmul.f32 %v4781_v54, %v4777_v47  ;;  %v5421_v47 = vld [vmem:[%s5900_s16 + $0x68] sm:$0xff]  ;;  %v5470_v54 = vld [vmem:[%s5900_s16 + $0x30] sm:$0xff] }
 0xa41   :  { %4497 = vmatmul.mubr.msk.f32.vlgmr.msra.gmra.mxu0 %vm455_vm6, %v1642_v55  ;;  %v5477_v55 = vld [vmem:[%s5900_s16 + $0x28] sm:$0xff] }
 0xa42   :  { %v4783_v56 = vpop.eup %4782  ;;  %4505 = vmatpush3.msra.mxu0 %v5323_v5 }
 0xa43   :  { %v1643_v57 = vmul.f32 %v4783_v56, %v4779_v38  ;;  %4506 = vmatprep.subr.mxu0 %v113_v59  ;;  %v5435_v38 = vld [vmem:[%s5900_s16 + $0x58] sm:$0xff]  ;;  %v5484_v56 = vld [vmem:[%s5900_s16 + $0x20] sm:$0xff] }
 0xa44   :  { %4507 = vmatpush3.msra.mxu0 %v113_v59 }
 0xa45   :  { %4502 = vmatmul.mubr.msk.f32.vlgmr.msra.gmra.mxu1 %vm455_vm6, %v1643_v57  ;;  %4508 = vmatprep.subr.mxu0 %v5333_v62 }
 0xa46   :  { %4509 = vmatpush3.msra.mxu0 %v5333_v62  ;;  %4516 = vmatpush3.msra.mxu1 %v5380_v41 }
 0xa47   :  { %4510 = vmatprep.subr.mxu0 %v111_v63  ;;  %4517 = vmatprep.subr.mxu1 %v5385_v42 }
 0xa48   :  { %4511 = vmatpush3.msra.mxu0 %v111_v63  ;;  %4518 = vmatpush3.msra.mxu1 %v5385_v42 }
 0xa49   :  { %4519 = vmatprep.subr.mxu1 %v5392_v43  ;;  %4526 = vmatprep.subr.mxu0 %v5409_v45 }
 0xa4a   :  { %4520 = vmatpush3.msra.mxu1 %v5392_v43 }
 0xa4b   :  { %4521 = vmatprep.subr.mxu1 %v5401_v44 }
 0xa4c   :  { %4522 = vmatpush3.msra.mxu1 %v5401_v44 }
 0xa4d   :  { %4561 = vmatprep.subr.mxu1 %v5076_v14 }
 0xb01   :  { %v1716_v3 = vpop.f32.mrf.mxu0 }
 0xb02   :  { %1814 = vrot.lane.b32.xlu0 %v1716_v3, %s4943_s4 }
 0xb03   :  { %v4498_v6 = vpop.f32.mrf.mxu0 }
 0xb05   :  { %v1792_v58 = vpop.f32.mrf.mxu1 }
 0xb06   :  { %1816 = vrot.lane.b32.xlu1 %v1792_v58, %s4943_s4 }
 0xb07   :  { %v4503_v61 = vpop.f32.mrf.mxu1 }
 0xb74   :  { %v1815_v13 = vpop.permute.xlu0 %1814 }
 0xb75   :  { %v1826_v19 = vsel %vm1825_vm9, %v1823_v11, %v1815_v13 }
 0xb76   :  { %4512 = vmatprep.mubr.msk.f32.mxu0 %vm148_vm0, %v1826_v19 }
 0xb78   :  { %v1817_v60 = vpop.permute.xlu1 %1816 }
 0xb79   :  { %v1827_v22 = vsel %vm1825_vm9, %v1824_v21, %v1817_v60  ;;  %v5493_v21 = vld [vmem:[%s5896_s12] ss:$0 sm:$0xff] }
 0xb7a   :  { %4513 = vmatmul.mubr.msk.f32.vlgmr.msra.gmra.mxu0 %vm148_vm0, %v1827_v22 }
 0xb7b   :  { %4527 = vmatpush3.msra.mxu0 %v5409_v45 }
 0xb7c   :  { %4528 = vmatprep.subr.mxu0 %v5414_v46 }
 0xb7d   :  { %4529 = vmatpush3.msra.mxu0 %v5414_v46 }
 0xb7e   :  { %4530 = vmatprep.subr.mxu0 %v5421_v47 }
 0xb7f   :  { %4531 = vmatpush3.msra.mxu0 %v5421_v47 }
 0xb80   :  { %4532 = vmatprep.subr.mxu0 %v5428_v4 }
 0xb81   :  { %4533 = vmatpush3.msra.mxu0 %v5428_v4 }
 0xb82   :  { %4534 = vmatprep.subr.mxu0 %v5435_v38 }
 0xb83   :  { %4535 = vmatpush3.msra.mxu0 %v5435_v38 }
 0xb84   :  { %4536 = vmatprep.subr.mxu0 %v5442_v48 }
 0xb85   :  { %4537 = vmatpush3.msra.mxu0 %v5442_v48 }
 0xb86   :  { %4538 = vmatprep.subr.mxu0 %v5449_v40 }
 0xb87   :  { %4539 = vmatpush3.msra.mxu0 %v5449_v40 }
 0xb88   :  { %4540 = vmatprep.subr.mxu0 %v5456_v49 }
 0xb89   :  { %4541 = vmatpush3.msra.mxu0 %v5456_v49 }
 0xb8a   :  { %4542 = vmatprep.subr.mxu0 %v5463_v51 }
 0xb8b   :  { %4543 = vmatpush3.msra.mxu0 %v5463_v51 }
 0xb8c   :  { %4544 = vmatprep.subr.mxu0 %v5470_v54 }
 0xb8d   :  { %4545 = vmatpush3.msra.mxu0 %v5470_v54 }
 0xb8e   :  { %4546 = vmatprep.subr.mxu0 %v5477_v55 }
 0xb8f   :  { %4547 = vmatpush3.msra.mxu0 %v5477_v55 }
 0xb90   :  { %4548 = vmatprep.subr.mxu0 %v5484_v56 }
 0xb91   :  { %4549 = vmatpush3.msra.mxu0 %v5484_v56 }
 0xc3a   :  { %v4514_v24 = vpop.f32.mrf.mxu0 }
 0xc3b   :  { %v1910_v25 = vadd.f32 %v4514_v24, %v5063_v1 }
 0xc3c   :  { %v1900_v26 = vpop.f32.mrf.mxu0 }
 0xc3d   :  { %v5356_v27 = vadd.f32 %v4188_v50, %v1910_v25  ;;  %v1909_v28 = vadd.f32 %v1900_v26, %v5061_v0 }
 0xc3f   :  { %v5359_v53 = vadd.f32 %v4188_v50, %v1909_v28  ;;  %v1922_v29 = vsel %vm148_vm0, %v5356_v27, 0.0  ;;  %v5500_v50 = vld [vmem:[%s5897_s13] ss:$0 sm:$0xff] }
 0xc40   :  { %1923 = vadd.xlane.f32.xlu1 %v1922_v29 }
 0xc41   :  { %v1919_v30 = vsel %vm148_vm0, %v5359_v53, 0.0 }
 0xc42   :  { %1920 = vadd.xlane.f32.xlu0 %v1919_v30 }
 0xcc9   :  { %v1924_v31 = vpop.xlane.xlu1 %1923 }
 0xcca   :  { %v1926_v32 = vmul.f32 0.03125, %v1924_v31  ;;  %v5519_v31 = vld [vmem:[%s5900_s16 + $0x18] sm:$0xff] }
 0xccb   :  { %v1921_v33 = vpop.xlane.xlu0 %1920  ;;  %4550 = vmatprep.subr.mxu0 %v5519_v31 }
 0xccc   :  { %v1925_v34 = vmul.f32 0.03125, %v1921_v33  ;;  %v5366_v1 = vsub.f32 %v5356_v27, %v1926_v32  ;;  %4551 = vmatpush3.msra.mxu0 %v5519_v31 }
 0xcce   :  { %v5369_v35 = vsub.f32 %v5359_v53, %v1925_v34  ;;  %v1930_v37 = vmul.f32 %v5366_v1, %v5366_v1  ;;  %v1964_v25 = vmul.f32 %v5493_v21, %v5366_v1 }
 0xcd0   :  { %v1929_v0 = vmul.f32 %v5369_v35, %v5369_v35  ;;  %v1934_v39 = vsel %vm148_vm0, %v1930_v37, 0.0  ;;  %v1963_v60 = vmul.f32 %v5493_v21, %v5369_v35 }
 0xcd2   :  { %v1931_v36 = vsel %vm148_vm0, %v1929_v0, 0.0  ;;  %v5557_v0 = vld [vmem:[%s5901_s17] ss:$0 sm:$0xff] }
 0xcd3   :  { %1932 = vadd.xlane.f32.xlu0 %v1931_v36 }
 0xcd7   :  { %1935 = vadd.xlane.f32.xlu0 %v1934_v39 }
 0xd5c   :  { %v1933_v57 = vpop.xlane.xlu0 %1932 }
 0xd5d   :  { %v1937_v59 = vmul.f32 0.032258064, %v1933_v57 }
 0xd5f   :  { %4784 = vrsqrt.f32 %v1937_v59  ;;  %vm1941_vm11 = vcmp.eq.f32.partialorder %v1937_v59, inf  ;;  %v1944_v61 = vand.u32 2147483648, %v1937_v59  ;;  %vm1943_vm12 = vcmp.eq.f32.partialorder %v1937_v59, 0.0 }
 0xd60   :  { %v1936_v63 = vpop.xlane.xlu0 %1935 }
 0xd61   :  { %v1938_v3 = vmul.f32 0.032258064, %v1936_v63 }
 0xd63   :  { %4786 = vrsqrt.f32 %v1938_v3  ;;  %vm1948_vm13 = vcmp.eq.f32.partialorder %v1938_v3, inf  ;;  %v1951_v11 = vand.u32 2147483648, %v1938_v3  ;;  %vm1950_vm14 = vcmp.eq.f32.partialorder %v1938_v3, 0.0 }
 0xd6c   :  { %v4785_v6 = vpop.eup %4784 }
 0xd6d   :  { %v1940_v58 = vmul.f32 %v4785_v6, %v1937_v59 }
 0xd6f   :  { %v1942_v2 = vsel %vm1941_vm11, %v1937_v59, %v1940_v58 }
 0xd70   :  { %v4787_v7 = vpop.eup %4786  ;;  %v1945_v8 = vsel %vm1943_vm12, %v1944_v61, %v1942_v2 }
 0xd71   :  { %v1953_v9 = vadd.f32 1e-06, %v1945_v8  ;;  %v1947_v10 = vmul.f32 %v4787_v7, %v1938_v3 }
 0xd73   :  { %4788 = vrcp.f32 %v1953_v9  ;;  %v1949_v13 = vsel %vm1948_vm13, %v1938_v3, %v1947_v10 }
 0xd74   :  { %v1952_v19 = vsel %vm1950_vm14, %v1951_v11, %v1949_v13 }
 0xd75   :  { %v1954_v20 = vadd.f32 1e-06, %v1952_v19 }
 0xd77   :  { %4790 = vrcp.f32 %v1954_v20 }
 0xd80   :  { %v4789_v22 = vpop.eup %4788 }
 0xd81   :  { %v1965_v24 = vmul.f32 %v4789_v22, %v1963_v60 }
 0xd83   :  { %v1973_v26 = vadd.f32 %v5500_v50, %v1965_v24 }
 0xd84   :  { %v4791_v28 = vpop.eup %4790 }
 0xd85   :  { %4523 = vmatprep.mubr.msk.f32.mxu1 %vm148_vm0, %v1973_v26  ;;  %v1966_v29 = vmul.f32 %v4791_v28, %v1964_v25 }
 0xd87   :  { %v1974_v30 = vadd.f32 %v5500_v50, %v1966_v29 }
 0xd89   :  { %4524 = vmatmul.mubr.msk.f32.vlgmr.msra.gmra.mxu1 %vm148_vm0, %v1974_v30 }
 0xd8a   :  { %4562 = vmatpush3.msra.mxu1 %v5076_v14  ;;  %v5526_v14 = vld [vmem:[%s5900_s16 + $0x10] sm:$0xff] }
 0xd8b   :  { %4563 = vmatprep.subr.mxu1 %v5081_v15  ;;  %4552 = vmatprep.subr.mxu0 %v5526_v14 }
 0xd8c   :  { %4564 = vmatpush3.msra.mxu1 %v5081_v15  ;;  %4553 = vmatpush3.msra.mxu0 %v5526_v14  ;;  %v5533_v15 = vld [vmem:[%s5900_s16 + $0x8] sm:$0xff] }
 0xd8d   :  { %4565 = vmatprep.subr.mxu1 %v5088_v16  ;;  %4554 = vmatprep.subr.mxu0 %v5533_v15 }
 0xd8e   :  { %4566 = vmatpush3.msra.mxu1 %v5088_v16  ;;  %v5539_v16 = vld [vmem:[%s5900_s16] sm:$0xff]  ;;  %4555 = vmatpush3.msra.mxu0 %v5533_v15 }
 0xd8f   :  { %4567 = vmatprep.subr.mxu1 %v5097_v17  ;;  %4556 = vmatprep.subr.mxu0 %v5539_v16 }
 0xd90   :  { %4568 = vmatpush3.msra.mxu1 %v5097_v17  ;;  %4557 = vmatpush3.msra.mxu0 %v5539_v16  ;;  %v5548_v17 = vld [vmem:[%s5899_s15] ss:$0 sm:$0xff]  ;;  %s4944_s15 = smov [#allocation7]  }
 0xd91   :  { %4572 = vmatprep.subr.mxu1 %v5102_v18  ;;  %4604 = vmatprep.subr.mxu0 %v4938_v52  ;;  %s4138_s17 = sshll.u32 %s4944_s15, 4  ;;  %s4139_s17 = int_to_ptr.vmem [resolvable:$true] %s4138_s17 }
 0xd92   :  { %p4911_p11 = scmp.lt.s32.totalorder %s4139_s17, %s4139_s17 }
 0xe49   :  { %v4525_v18 = vpop.f32.mrf.mxu1 }
 0xe4a   :  { %v2059_v32 = vadd.f32 %v4525_v18, %v5548_v17 }
 0xe4b   :  { %v2053_v33 = vpop.f32.mrf.mxu1 }
 0xe4c   :  { %v2054_v34 = vadd.f32 %v5548_v17, %v2053_v33  ;;  %v2063_v35 = vmax.f32 %v2059_v32, 0.0 }
 0xe4e   :  { %v2062_v1 = vmax.f32 %v2054_v34, 0.0 }
 0xe50   :  { %4558 = vmatprep.mubr.f32.mxu0 %v2062_v1 }
 0xe51   :  { %4559 = vmatmul.mubr.f32.vlgmr.msra.gmra.mxu0 %v2063_v35 }
 0xe52   :  { %4606 = vmatprep.mubr.msk.f32.mxu0 %vm4939_vm5, %v4938_v52 }
 0xf11   :  { %v4560_v36 = vpop.f32.mrf.mxu0 }
 0xf12   :  { %v2140_v37 = vadd.f32 %v4560_v36, %v5356_v27  ;;  %v4848_v36 = vld [vmem:[%s5894_s10] ss:$0 sm:$0xff] }
 0xf13   :  { %v2130_v39 = vpop.f32.mrf.mxu0 }
 0xf14   :  { %v5561_v57 = vadd.f32 %v5557_v0, %v2140_v37  ;;  %v2139_v59 = vadd.f32 %v2130_v39, %v5359_v53 }
 0xf16   :  { %v5565_v63 = vadd.f32 %v5557_v0, %v2139_v59  ;;  %v2152_v3 = vsel %vm148_vm0, %v5561_v57, 0.0 }
 0xf17   :  { %2153 = vadd.xlane.f32.xlu1 %v2152_v3 }
 0xf18   :  { %v2149_v6 = vsel %vm148_vm0, %v5565_v63, 0.0 }
 0xf19   :  { %2150 = vadd.xlane.f32.xlu0 %v2149_v6 }
 0xfa0   :  { %v2154_v58 = vpop.xlane.xlu1 %2153 }
 0xfa1   :  { %v2156_v61 = vmul.f32 0.03125, %v2154_v58  ;;  %v4849_v58 = vld [vmem:[%s5895_s11] ss:$0 sm:$0xff] }
 0xfa2   :  { %v2151_v27 = vpop.xlane.xlu0 %2150 }
 0xfa3   :  { %v2158_v2 = vsub.f32 %v5561_v57, %v2156_v61  ;;  %v2155_v7 = vmul.f32 0.03125, %v2151_v27 }
 0xfa5   :  { %v2157_v8 = vsub.f32 %v5565_v63, %v2155_v7  ;;  %v2160_v53 = vmul.f32 %v2158_v2, %v2158_v2  ;;  %v2188_v37 = vmul.f32 %v4848_v36, %v2158_v2  ;;  %v4850_v7 = vld [vmem:[%s5916_s1 + $0x18] sm:$0xff]  ;;  %v4851_v2 = vld [vmem:[%s5916_s1 + $0x10] sm:$0xff] }
 0xfa7   :  { %v2164_v9 = vsel %vm148_vm0, %v2160_v53, 0.0  ;;  %v2159_v10 = vmul.f32 %v2157_v8, %v2157_v8  ;;  %v2187_v39 = vmul.f32 %v4848_v36, %v2157_v8  ;;  %v4852_v8 = vld [vmem:[%s5916_s1 + $0x8] sm:$0xff]  ;;  %v4853_v53 = vld [vmem:[%s5916_s1] sm:$0xff] }
 0xfa8   :  { %2165 = vadd.xlane.f32.xlu1 %v2164_v9  ;;  %v4854_v9 = vld [vmem:[%s5890_s6 + $0x18] sm:$0xff] }
 0xfa9   :  { %v2161_v11 = vsel %vm148_vm0, %v2159_v10, 0.0  ;;  %v4855_v10 = vld [vmem:[%s5890_s6 + $0x10] sm:$0xff] }
 0xfaa   :  { %2162 = vadd.xlane.f32.xlu0 %v2161_v11  ;;  %v4856_v11 = vld [vmem:[%s5890_s6 + $0x8] sm:$0xff] }
0x1031   :  { %v2166_v13 = vpop.xlane.xlu1 %2165 }
0x1032   :  { %v2168_v19 = vmul.f32 0.032258064, %v2166_v13  ;;  %v4857_v13 = vld [vmem:[%s5890_s6] sm:$0xff] }
0x1033   :  { %v2163_v20 = vpop.xlane.xlu0 %2162 }
0x1034   :  { %4792 = vrsqrt.f32 %v2168_v19  ;;  %v2167_v60 = vmul.f32 0.032258064, %v2163_v20  ;;  %vm2178_vm15 = vcmp.eq.f32.partialorder %v2168_v19, inf  ;;  %v2181_v25 = vand.u32 2147483648, %v2168_v19 }
0x1035   :  { %vm2180_vm1 = vcmp.eq.f32.partialorder %v2168_v19, 0.0 }
0x1036   :  { %4794 = vrsqrt.f32 %v2167_v60  ;;  %vm2171_vm2 = vcmp.eq.f32.partialorder %v2167_v60, inf  ;;  %v2174_v32 = vand.u32 2147483648, %v2167_v60  ;;  %vm2173_vm3 = vcmp.eq.f32.partialorder %v2167_v60, 0.0 }
0x1041   :  { %v4793_v22 = vpop.eup %4792 }
0x1042   :  { %v2177_v24 = vmul.f32 %v4793_v22, %v2168_v19 }
0x1043   :  { %v4795_v26 = vpop.eup %4794 }
0x1044   :  { %v2179_v28 = vsel %vm2178_vm15, %v2168_v19, %v2177_v24  ;;  %v2170_v30 = vmul.f32 %v4795_v26, %v2167_v60  ;;  %v4858_v24 = vld [vmem:[%s5889_s5] ss:$0 sm:$0xff] }
0x1045   :  { %v2182_v29 = vsel %vm2180_vm1, %v2181_v25, %v2179_v28  ;;  %v4859_v26 = vld [vmem:[%s5917_s22] ss:$0 sm:$0xff] }
0x1046   :  { %v2184_v18 = vadd.f32 1e-06, %v2182_v29  ;;  %v2172_v33 = vsel %vm2171_vm2, %v2167_v60, %v2170_v30 }
0x1047   :  { %v2175_v34 = vsel %vm2173_vm3, %v2174_v32, %v2172_v33  ;;  %v4860_v33 = vld [vmem:[%s5891_s7] ss:$0 sm:$0xff] }
0x1048   :  { %4796 = vrcp.f32 %v2184_v18  ;;  %v2183_v1 = vadd.f32 1e-06, %v2175_v34 }
0x104a   :  { %4798 = vrcp.f32 %v2183_v1 }
0x1055   :  { %v4797_v35 = vpop.eup %4796 }
0x1056   :  { %v2190_v3 = vmul.f32 %v4797_v35, %v2188_v37 }
0x1057   :  { %v4799_v59 = vpop.eup %4798 }
0x1058   :  { %v2189_v6 = vmul.f32 %v4799_v59, %v2187_v39  ;;  %v2192_v27 = vadd.f32 %v4849_v58, %v2190_v3 }
0x105a   :  { %v2191_v61 = vadd.f32 %v4849_v58, %v2189_v6 }
0x105c   :  { %4569 = vmatprep.mubr.msk.f32.mxu1 %vm148_vm0, %v2191_v61 }
0x105d   :  { %4570 = vmatmul.mubr.msk.f32.vlgmr.msra.gmra.mxu1 %vm148_vm0, %v2192_v27 }
0x105e   :  { %4573 = vmatpush3.msra.mxu1 %v4850_v7  ;;  %4580 = vmatprep.mubr.msk.f32.mxu1 %vm148_vm0, %v2191_v61 }
0x105f   :  { %4574 = vmatprep.subr.mxu1 %v4851_v2 }
0x1060   :  { %4575 = vmatpush3.msra.mxu1 %v4851_v2 }
0x1061   :  { %4576 = vmatprep.subr.mxu1 %v4852_v8 }
0x1062   :  { %4577 = vmatpush3.msra.mxu1 %v4852_v8 }
0x1063   :  { %4578 = vmatprep.subr.mxu1 %v4853_v53 }
0x1064   :  { %4579 = vmatpush3.msra.mxu1 %v4853_v53 }
0x1065   :  { %4581 = vmatmul.mubr.msk.f32.vlgmr.msra.gmra.mxu1 %vm148_vm0, %v2192_v27  ;;  %4583 = vmatprep.subr.mxu1 %v4854_v9 }
0x1066   :  { %4584 = vmatpush3.msra.mxu1 %v4854_v9  ;;  %4591 = vmatprep.mubr.msk.f32.mxu1 %vm148_vm0, %v2191_v61 }
0x1067   :  { %4585 = vmatprep.subr.mxu1 %v4855_v10 }
0x1068   :  { %4586 = vmatpush3.msra.mxu1 %v4855_v10 }
0x1069   :  { %4587 = vmatprep.subr.mxu1 %v4856_v11 }
0x106a   :  { %4588 = vmatpush3.msra.mxu1 %v4856_v11 }
0x106b   :  { %4589 = vmatprep.subr.mxu1 %v4857_v13 }
0x106c   :  { %4590 = vmatpush3.msra.mxu1 %v4857_v13 }
0x106d   :  { %4592 = vmatmul.mubr.msk.f32.vlgmr.msra.gmra.mxu1 %vm148_vm0, %v2192_v27  ;;  %4594 = vmatprep.subr.mxu1 %v4938_v52 }
0x106e   :  { %4596 = vmatprep.mubr.msk.f32.mxu1 %vm4939_vm5, %v4938_v52 }
0x111d   :  { %v4571_v19 = vpop.f32.mrf.mxu1 }
0x111e   :  { %v5635_v18 = vadd.f32 %v4859_v26, %v4571_v19 }
0x111f   :  { %v2265_v20 = vpop.f32.mrf.mxu1 }
0x1120   :  { %v5624_v28 = vadd.f32 %v4859_v26, %v2265_v20 }
0x1125   :  { %v4582_v60 = vpop.f32.mrf.mxu1 }
0x1126   :  { %v5627_v29 = vadd.f32 %v4858_v24, %v4582_v60 }
0x1127   :  { %v2340_v22 = vpop.f32.mrf.mxu1 }
0x1128   :  { %v5617_v25 = vadd.f32 %v4858_v24, %v2340_v22 }
0x112a   :  { %4595 = vmatpush3.xpose.msk.msra.mxu1 %vm455_vm6, %v5617_v25 }
0x112b   :  { %4599 = vmatprep.subr.mxu1 %v4938_v52 }
0x112d   :  { %v4593_v30 = vpop.f32.mrf.mxu1  ;;  %4597 = vmatmul.mubr.msk.f32.vlgmr.msra.gmra.mxu1 %vm455_vm6, %v5624_v28 }
0x112e   :  { %4600 = vmatpush3.xpose.msk.msra.mxu1 %vm455_vm6, %v5627_v29  ;;  %4601 = vmatprep.mubr.msk.f32.mxu1 %vm4939_vm5, %v4938_v52  ;;  %v5641_v34 = vadd.f32 %v4860_v33, %v4593_v30 }
0x112f   :  { %v2415_v32 = vpop.f32.mrf.mxu1  ;;  %4609 = vmatprep.subr.mxu1 %v4938_v52 }
0x1130   :  { %v5643_v1 = vadd.f32 %v4860_v33, %v2415_v32 }
0x1131   :  { %4602 = vmatmul.mubr.msk.f32.vlgmr.msra.gmra.mxu1 %vm455_vm6, %v5635_v18 }
0x1132   :  { %4605 = vmatpush3.msra.mxu0 %v5643_v1  ;;  %4610 = vmatpush3.msra.mxu1 %v5641_v34 }
0x1133   :  { %4614 = vmatprep.subr.mxu0 %v4938_v52  ;;  %4611 = vmatprep.mubr.msk.f32.mxu1 %vm4939_vm5, %v4938_v52 }
0x1134   :  { %4619 = vmatprep.subr.mxu1 %v4938_v52 }
0x11ed   :  { %v2496_v35 = vpop.f32.mrf.mxu1 }
0x11ee   :  { %v2576_v36 = vmul.f32 0.35355338, %v2496_v35 }
0x11ef   :  { %v4598_v37 = vpop.f32.mrf.mxu1 }
0x11f0   :  { %v2578_v39 = vadd.f32 %v2576_v36, %v5187_v12 }
0x11f1   :  { %v2572_v59 = vpop.f32.mrf.mxu1 }
0x11f2   :  { %v2577_v3 = vmul.f32 0.35355338, %v2572_v59  ;;  %v2580_v6 = vsel %vm455_vm6, %v2578_v39, -inf }
0x11f3   :  { %2581 = vmax.xlane.f32.xlu0 %v2580_v6  ;;  %v4603_v58 = vpop.f32.mrf.mxu1 }
0x11f4   :  { %v2579_v61 = vadd.f32 %v2577_v3, %v5191_v23 }
0x11f6   :  { %v2583_v27 = vsel %vm455_vm6, %v2579_v61, -inf }
0x11f7   :  { %2584 = vmax.xlane.f32.xlu1 %v2583_v27 }
0x1208   :  { %2828 = vrot.lane.b32.xlu1 %v5627_v29, %s4940_s3 }
0x120c   :  { %2748 = vrot.lane.b32.xlu1 %v5624_v28, %s4940_s3 }
0x127c   :  { %v2582_v7 = vpop.xlane.xlu0 %2581 }
0x127d   :  { %v2586_v2 = vsub.f32 %v2578_v39, %v2582_v7 }
0x127f   :  { %v2588_v8 = vmul.f32 1.442695, %v2586_v2 }
0x1280   :  { %v2585_v53 = vpop.xlane.xlu1 %2584 }
0x1281   :  { %4800 = vpow2.f32 %v2588_v8  ;;  %v2587_v9 = vsub.f32 %v2579_v61, %v2585_v53 }
0x1283   :  { %v2590_v10 = vmul.f32 1.442695, %v2587_v9 }
0x1284   :  { %v2829_v60 = vpop.permute.xlu1 %2828 }
0x1285   :  { %4802 = vpow2.f32 %v2590_v10 }
0x1288   :  { %v2749_v22 = vpop.permute.xlu1 %2748 }
0x128e   :  { %v4801_v11 = vpop.eup %4800 }
0x128f   :  { %v2592_v13 = vsel %vm455_vm6, %v4801_v11, 0.0 }
0x1290   :  { %2593 = vadd.xlane.f32.xlu0 %v2592_v13 }
0x1292   :  { %v4803_v19 = vpop.eup %4802 }
0x1293   :  { %v2595_v20 = vsel %vm455_vm6, %v4803_v19, 0.0 }
0x1294   :  { %2596 = vadd.xlane.f32.xlu1 %v2595_v20 }
0x12a5   :  { %2826 = vrot.lane.b32.xlu1 %v5635_v18, %s4940_s3 }
0x12a6   :  { %2750 = vrot.lane.b32.xlu0 %v5617_v25, %s4940_s3 }
0x1319   :  { %v2594_v24 = vpop.xlane.xlu0 %2593 }
0x131a   :  { %4804 = vrcp.f32 %v2594_v24 }
0x131d   :  { %v2597_v26 = vpop.xlane.xlu1 %2596  ;;  %v2751_v33 = vpop.permute.xlu0 %2750 }
0x131e   :  { %4806 = vrcp.f32 %v2597_v26 }
0x1321   :  { %v2827_v37 = vpop.permute.xlu1 %2826 }
0x1327   :  { %v4805_v30 = vpop.eup %4804 }
0x1328   :  { %v2600_v32 = vmul.f32 %v4805_v30, %v4801_v11 }
0x132a   :  { %4607 = vmatmul.mubr.msk.f32.vlgmr.msra.gmra.mxu0 %vm455_vm6, %v2600_v32 }
0x132b   :  { %v4807_v35 = vpop.eup %4806  ;;  %4615 = vmatpush3.xpose.msk.msra.mxu0 %vm455_vm6, %v2751_v33  ;;  %4616 = vmatprep.mubr.msk.f32.mxu0 %vm4939_vm5, %v4938_v52 }
0x132c   :  { %v2601_v36 = vmul.f32 %v4807_v35, %v4803_v19  ;;  %4624 = vmatprep.subr.mxu0 %v4938_v52 }
0x132e   :  { %4612 = vmatmul.mubr.msk.f32.vlgmr.msra.gmra.mxu1 %vm455_vm6, %v2601_v36  ;;  %4617 = vmatmul.mubr.msk.f32.vlgmr.msra.gmra.mxu0 %vm455_vm6, %v2749_v22 }
0x132f   :  { %4620 = vmatpush3.xpose.msk.msra.mxu1 %vm455_vm6, %v2829_v60  ;;  %4621 = vmatprep.mubr.msk.f32.mxu1 %vm4939_vm5, %v4938_v52 }
0x1330   :  { %4629 = vmatprep.subr.mxu1 %v4938_v52  ;;  %4626 = vmatprep.mubr.msk.f32.mxu0 %vm4939_vm5, %v4938_v52 }
0x1332   :  { %4622 = vmatmul.mubr.msk.f32.vlgmr.msra.gmra.mxu1 %vm455_vm6, %v2827_v37 }
0x1333   :  { %4631 = vmatprep.mubr.msk.f32.mxu1 %vm4939_vm5, %v4938_v52 }
0x13ea   :  { %v5683_v39 = vpop.f32.mrf.mxu0 }
0x13ec   :  { %v4608_v59 = vpop.f32.mrf.mxu0 }
0x13ee   :  { %v5685_v3 = vpop.f32.mrf.mxu1  ;;  %v2822_v6 = vpop.f32.mrf.mxu0 }
0x13ef   :  { %v2904_v58 = vmul.f32 0.35355338, %v2822_v6 }
0x13f0   :  { %v4613_v61 = vpop.f32.mrf.mxu1  ;;  %v4618_v27 = vpop.f32.mrf.mxu0 }
0x13f1   :  { %v2906_v7 = vadd.f32 %v2904_v58, %v5187_v12 }
0x13f2   :  { %v2900_v2 = vpop.f32.mrf.mxu1 }
0x13f3   :  { %v2905_v8 = vmul.f32 0.35355338, %v2900_v2  ;;  %v2908_v53 = vsel %vm455_vm6, %v2906_v7, -inf }
0x13f4   :  { %2909 = vmax.xlane.f32.xlu0 %v2908_v53  ;;  %v4623_v9 = vpop.f32.mrf.mxu1 }
0x13f5   :  { %v2907_v10 = vadd.f32 %v2905_v8, %v5191_v23 }
0x13f7   :  { %v2911_v11 = vsel %vm455_vm6, %v2907_v10, -inf }
0x13f8   :  { %2912 = vmax.xlane.f32.xlu1 %v2911_v11 }
0x1409   :  { %3008 = vrot.lane.b32.xlu1 %v5641_v34, %s4940_s3 }
0x140a   :  { %2931 = vrot.lane.b32.xlu0 %v5643_v1, %s4940_s3 }
0x140d   :  { %3086 = vrot.lane.b32.xlu1 %v5617_v25, %s4941_s26 }
0x1411   :  { %3164 = vrot.lane.b32.xlu1 %v5627_v29, %s4941_s26 }
0x1415   :  { %3162 = vrot.lane.b32.xlu1 %v5635_v18, %s4941_s26 }
0x147d   :  { %v2910_v13 = vpop.xlane.xlu0 %2909 }
0x147e   :  { %v2914_v19 = vsub.f32 %v2906_v7, %v2910_v13 }
0x1480   :  { %v2916_v20 = vmul.f32 1.442695, %v2914_v19 }
0x1481   :  { %v2932_v60 = vpop.permute.xlu0 %2931  ;;  %v2913_v22 = vpop.xlane.xlu1 %2912 }
0x1482   :  { %4808 = vpow2.f32 %v2916_v20  ;;  %v2915_v24 = vsub.f32 %v2907_v10, %v2913_v22  ;;  %4625 = vmatpush3.msra.mxu0 %v2932_v60 }
0x1483   :  { %4634 = vmatprep.subr.mxu0 %v4938_v52 }
0x1484   :  { %v2918_v26 = vmul.f32 1.442695, %v2915_v24 }
0x1485   :  { %v3009_v30 = vpop.permute.xlu1 %3008 }
0x1486   :  { %4810 = vpow2.f32 %v2918_v26  ;;  %4630 = vmatpush3.msra.mxu1 %v3009_v30 }
0x1487   :  { %4639 = vmatprep.subr.mxu1 %v4938_v52 }
0x1489   :  { %v3087_v6 = vpop.permute.xlu1 %3086 }
0x148d   :  { %v3165_v7 = vpop.permute.xlu1 %3164 }
0x148f   :  { %v4809_v32 = vpop.eup %4808 }
0x1490   :  { %v2920_v33 = vsel %vm455_vm6, %v4809_v32, 0.0 }
0x1491   :  { %2921 = vadd.xlane.f32.xlu0 %v2920_v33  ;;  %v3163_v53 = vpop.permute.xlu1 %3162 }
0x1493   :  { %v4811_v35 = vpop.eup %4810 }
0x1494   :  { %v2923_v36 = vsel %vm455_vm6, %v4811_v35, 0.0 }
0x1495   :  { %2924 = vadd.xlane.f32.xlu0 %v2923_v36 }
0x14ab   :  { %3084 = vrot.lane.b32.xlu0 %v5624_v28, %s4941_s26 }
0x151a   :  { %v2922_v37 = vpop.xlane.xlu0 %2921 }
0x151b   :  { %4812 = vrcp.f32 %v2922_v37 }
0x151e   :  { %v2925_v59 = vpop.xlane.xlu0 %2924 }
0x151f   :  { %4814 = vrcp.f32 %v2925_v59 }
0x1522   :  { %v3085_v8 = vpop.permute.xlu0 %3084 }
0x1528   :  { %v4813_v58 = vpop.eup %4812 }
0x1529   :  { %v2928_v61 = vmul.f32 %v4813_v58, %v4809_v32 }
0x152b   :  { %4627 = vmatmul.mubr.msk.f32.vlgmr.msra.gmra.mxu0 %vm455_vm6, %v2928_v61 }
0x152c   :  { %v4815_v27 = vpop.eup %4814  ;;  %4635 = vmatpush3.xpose.msk.msra.mxu0 %vm455_vm6, %v3087_v6  ;;  %4636 = vmatprep.mubr.msk.f32.mxu0 %vm4939_vm5, %v4938_v52 }
0x152d   :  { %v2929_v2 = vmul.f32 %v4815_v27, %v4811_v35  ;;  %4644 = vmatprep.subr.mxu0 %v4938_v52 }
0x152f   :  { %4632 = vmatmul.mubr.msk.f32.vlgmr.msra.gmra.mxu1 %vm455_vm6, %v2929_v2  ;;  %4637 = vmatmul.mubr.msk.f32.vlgmr.msra.gmra.mxu0 %vm455_vm6, %v3085_v8 }
0x1530   :  { %4640 = vmatpush3.xpose.msk.msra.mxu1 %vm455_vm6, %v3165_v7  ;;  %4641 = vmatprep.mubr.msk.f32.mxu1 %vm4939_vm5, %v4938_v52 }
0x1531   :  { %4649 = vmatprep.subr.mxu1 %v4938_v52  ;;  %4646 = vmatprep.mubr.msk.f32.mxu0 %vm4939_vm5, %v4938_v52 }
0x1533   :  { %4642 = vmatmul.mubr.msk.f32.vlgmr.msra.gmra.mxu1 %vm455_vm6, %v3163_v53 }
0x1534   :  { %4651 = vmatprep.mubr.msk.f32.mxu1 %vm4939_vm5, %v4938_v52 }
0x15eb   :  { %v5723_v9 = vpop.f32.mrf.mxu0 }
0x15ed   :  { %v4628_v10 = vpop.f32.mrf.mxu0 }
0x15ef   :  { %v5725_v11 = vpop.f32.mrf.mxu1  ;;  %v3158_v13 = vpop.f32.mrf.mxu0 }
0x15f0   :  { %v3240_v19 = vmul.f32 0.35355338, %v3158_v13 }
0x15f1   :  { %v4633_v20 = vpop.f32.mrf.mxu1  ;;  %v4638_v60 = vpop.f32.mrf.mxu0 }
0x15f2   :  { %v3242_v22 = vadd.f32 %v3240_v19, %v5187_v12 }
0x15f3   :  { %v3236_v24 = vpop.f32.mrf.mxu1 }
0x15f4   :  { %v3241_v26 = vmul.f32 0.35355338, %v3236_v24  ;;  %v3244_v30 = vsel %vm455_vm6, %v3242_v22, -inf }
0x15f5   :  { %3245 = vmax.xlane.f32.xlu0 %v3244_v30  ;;  %v4643_v32 = vpop.f32.mrf.mxu1 }
0x15f6   :  { %v3243_v33 = vadd.f32 %v3241_v26, %v5191_v23 }
0x15f8   :  { %v3247_v35 = vsel %vm455_vm6, %v3243_v33, -inf }
0x15f9   :  { %3248 = vmax.xlane.f32.xlu1 %v3247_v35 }
0x160a   :  { %3342 = vrot.lane.b32.xlu1 %v5641_v34, %s4941_s26 }
0x160b   :  { %3266 = vrot.lane.b32.xlu0 %v5643_v1, %s4941_s26 }
0x160e   :  { %3420 = vrot.lane.b32.xlu1 %v5617_v25, %s4942_s27 }
0x1612   :  { %3498 = vrot.lane.b32.xlu1 %v5627_v29, %s4942_s27 }
0x1616   :  { %3496 = vrot.lane.b32.xlu1 %v5635_v18, %s4942_s27 }
0x167e   :  { %v3246_v36 = vpop.xlane.xlu0 %3245 }
0x167f   :  { %v3250_v37 = vsub.f32 %v3242_v22, %v3246_v36 }
0x1681   :  { %v3252_v59 = vmul.f32 1.442695, %v3250_v37 }
0x1682   :  { %v3267_v6 = vpop.permute.xlu0 %3266  ;;  %v3249_v58 = vpop.xlane.xlu1 %3248 }
0x1683   :  { %4816 = vpow2.f32 %v3252_v59  ;;  %v3251_v61 = vsub.f32 %v3243_v33, %v3249_v58  ;;  %4645 = vmatpush3.msra.mxu0 %v3267_v6 }
0x1684   :  { %4654 = vmatprep.subr.mxu0 %v4938_v52 }
0x1685   :  { %v3254_v27 = vmul.f32 1.442695, %v3251_v61 }
0x1686   :  { %v3343_v7 = vpop.permute.xlu1 %3342 }
0x1687   :  { %4818 = vpow2.f32 %v3254_v27  ;;  %4650 = vmatpush3.msra.mxu1 %v3343_v7 }
0x1688   :  { %4659 = vmatprep.subr.mxu1 %v4938_v52 }
0x168a   :  { %v3421_v10 = vpop.permute.xlu1 %3420 }
0x168e   :  { %v3499_v60 = vpop.permute.xlu1 %3498 }
0x1690   :  { %v4817_v25 = vpop.eup %4816 }
0x1691   :  { %v3256_v29 = vsel %vm455_vm6, %v4817_v25, 0.0 }
0x1692   :  { %3257 = vadd.xlane.f32.xlu0 %v3256_v29  ;;  %v3497_v24 = vpop.permute.xlu1 %3496 }
0x1694   :  { %v4819_v18 = vpop.eup %4818 }
0x1695   :  { %v3259_v2 = vsel %vm455_vm6, %v4819_v18, 0.0 }
0x1696   :  { %3260 = vadd.xlane.f32.xlu0 %v3259_v2 }
0x16ac   :  { %3418 = vrot.lane.b32.xlu0 %v5624_v28, %s4942_s27 }
0x171b   :  { %v3258_v8 = vpop.xlane.xlu0 %3257 }
0x171c   :  { %4820 = vrcp.f32 %v3258_v8 }
0x171f   :  { %v3261_v53 = vpop.xlane.xlu0 %3260 }
0x1720   :  { %4822 = vrcp.f32 %v3261_v53 }
0x1723   :  { %v3419_v28 = vpop.permute.xlu0 %3418 }
0x1729   :  { %v4821_v13 = vpop.eup %4820 }
0x172a   :  { %v3264_v19 = vmul.f32 %v4821_v13, %v4817_v25 }
0x172c   :  { %4647 = vmatmul.mubr.msk.f32.vlgmr.msra.gmra.mxu0 %vm455_vm6, %v3264_v19 }
0x172d   :  { %v4823_v20 = vpop.eup %4822  ;;  %4655 = vmatpush3.xpose.msk.msra.mxu0 %vm455_vm6, %v3421_v10  ;;  %4656 = vmatprep.mubr.msk.f32.mxu0 %vm4939_vm5, %v4938_v52 }
0x172e   :  { %v3265_v22 = vmul.f32 %v4823_v20, %v4819_v18  ;;  %4664 = vmatprep.subr.mxu0 %v4938_v52 }
0x1730   :  { %4652 = vmatmul.mubr.msk.f32.vlgmr.msra.gmra.mxu1 %vm455_vm6, %v3265_v22  ;;  %4657 = vmatmul.mubr.msk.f32.vlgmr.msra.gmra.mxu0 %vm455_vm6, %v3419_v28  ;;  %v4861_v28 = vld [vmem:[%s5892_s8 + $0x18] sm:$0xff] }
0x1731   :  { %4660 = vmatpush3.xpose.msk.msra.mxu1 %vm455_vm6, %v3499_v60  ;;  %4661 = vmatprep.mubr.msk.f32.mxu1 %vm4939_vm5, %v4938_v52 }
0x1732   :  { %4669 = vmatprep.subr.mxu1 %v4938_v52  ;;  %4666 = vmatprep.mubr.msk.f32.mxu0 %vm4939_vm5, %v4938_v52 }
0x1734   :  { %4662 = vmatmul.mubr.msk.f32.vlgmr.msra.gmra.mxu1 %vm455_vm6, %v3497_v24  ;;  %v4862_v24 = vld [vmem:[%s5892_s8 + $0x10] sm:$0xff] }
0x1735   :  { %4671 = vmatprep.mubr.msk.f32.mxu1 %vm4939_vm5, %v4938_v52 }
0x17ec   :  { %v3338_v26 = vpop.f32.mrf.mxu0 }
0x17ee   :  { %v4648_v30 = vpop.f32.mrf.mxu0 }
0x17f0   :  { %v3414_v32 = vpop.f32.mrf.mxu1  ;;  %v3492_v33 = vpop.f32.mrf.mxu0 }
0x17f1   :  { %v3574_v35 = vmul.f32 0.35355338, %v3492_v33 }
0x17f2   :  { %v4653_v36 = vpop.f32.mrf.mxu1  ;;  %v4658_v37 = vpop.f32.mrf.mxu0 }
0x17f3   :  { %v3576_v59 = vadd.f32 %v3574_v35, %v5187_v12 }
0x17f4   :  { %v3570_v6 = vpop.f32.mrf.mxu1 }
0x17f5   :  { %v3575_v58 = vmul.f32 0.35355338, %v3570_v6  ;;  %v3578_v61 = vsel %vm455_vm6, %v3576_v59, -inf }
0x17f6   :  { %3579 = vmax.xlane.f32.xlu0 %v3578_v61  ;;  %v4663_v27 = vpop.f32.mrf.mxu1 }
0x17f7   :  { %v3577_v7 = vadd.f32 %v3575_v58, %v5191_v23 }
0x17f9   :  { %v3581_v25 = vsel %vm455_vm6, %v3577_v7, -inf }
0x17fa   :  { %3582 = vmax.xlane.f32.xlu1 %v3581_v25 }
0x180b   :  { %3676 = vrot.lane.b32.xlu1 %v5641_v34, %s4942_s27 }
0x180f   :  { %3754 = vrot.lane.b32.xlu1 %v5723_v9, %s4934_s2 }
0x1813   :  { %3756 = vrot.lane.b32.xlu1 %v5725_v11, %s4934_s2 }
0x1817   :  { %3764 = vrot.lane.b32.xlu1 %v3414_v32, %s4936_s29 }
0x187f   :  { %v3580_v52 = vpop.xlane.xlu0 %3579 }
0x1880   :  { %v3584_v12 = vsub.f32 %v3576_v59, %v3580_v52 }
0x1882   :  { %v3586_v29 = vmul.f32 1.442695, %v3584_v12 }
0x1883   :  { %v3583_v18 = vpop.xlane.xlu1 %3582 }
0x1884   :  { %4824 = vpow2.f32 %v3586_v29  ;;  %v3585_v23 = vsub.f32 %v3577_v7, %v3583_v18 }
0x1886   :  { %v3588_v2 = vmul.f32 1.442695, %v3585_v23 }
0x1887   :  { %v3677_v8 = vpop.permute.xlu1 %3676 }
0x1888   :  { %4826 = vpow2.f32 %v3588_v2  ;;  %4670 = vmatpush3.msra.mxu1 %v3677_v8 }
0x1889   :  { %4685 = vmatprep.subr.mxu1 %v5380_v41 }
0x188b   :  { %v3755_v33 = vpop.permute.xlu1 %3754 }
0x188c   :  { %v3776_v36 = vsel %vm455_vm6, %v5683_v39, %v3755_v33 }
0x1891   :  { %v4825_v34 = vpop.eup %4824 }
0x1892   :  { %v3590_v9 = vsel %vm455_vm6, %v4825_v34, 0.0 }
0x1893   :  { %3591 = vadd.xlane.f32.xlu0 %v3590_v9 }
0x1895   :  { %v4827_v53 = vpop.eup %4826 }
0x1896   :  { %v3593_v11 = vsel %vm455_vm6, %v4827_v53, 0.0 }
0x1897   :  { %3594 = vadd.xlane.f32.xlu0 %v3593_v11 }
0x18ad   :  { %3600 = vrot.lane.b32.xlu0 %v5643_v1, %s4942_s27 }
0x18b1   :  { %3762 = vrot.lane.b32.xlu0 %v3338_v26, %s4936_s29  ;;  %v4864_v26 = vld [vmem:[%s5892_s8] sm:$0xff] }
0x191c   :  { %v3592_v10 = vpop.xlane.xlu0 %3591 }
0x191d   :  { %4828 = vrcp.f32 %v3592_v10 }
0x1920   :  { %v3595_v13 = vpop.xlane.xlu0 %3594 }
0x1921   :  { %4830 = vrcp.f32 %v3595_v13 }
0x1924   :  { %v3601_v19 = vpop.permute.xlu0 %3600 }
0x1925   :  { %4665 = vmatpush3.msra.mxu0 %v3601_v19 }
0x1926   :  { %4674 = vmatprep.subr.mxu0 %v5323_v5  ;;  %v4863_v5 = vld [vmem:[%s5892_s8 + $0x8] sm:$0xff] }
0x1928   :  { %v3763_v35 = vpop.permute.xlu0 %3762 }
0x192a   :  { %v4829_v20 = vpop.eup %4828 }
0x192b   :  { %v3598_v60 = vmul.f32 %v4829_v20, %v4825_v34 }
0x192d   :  { %4667 = vmatmul.mubr.msk.f32.vlgmr.msra.gmra.mxu0 %vm455_vm6, %v3598_v60 }
0x192e   :  { %v4831_v22 = vpop.eup %4830  ;;  %4675 = vmatpush3.msra.mxu0 %v4861_v28 }
0x192f   :  { %v3599_v1 = vmul.f32 %v4831_v22, %v4827_v53  ;;  %4676 = vmatprep.subr.mxu0 %v4862_v24 }
0x1930   :  { %4677 = vmatpush3.msra.mxu0 %v4862_v24 }
0x1931   :  { %4672 = vmatmul.mubr.msk.f32.vlgmr.msra.gmra.mxu1 %vm455_vm6, %v3599_v1  ;;  %4678 = vmatprep.subr.mxu0 %v5333_v62 }
0x1932   :  { %4679 = vmatpush3.msra.mxu0 %v4863_v5  ;;  %4686 = vmatpush3.msra.mxu1 %v5380_v41 }
0x1933   :  { %4680 = vmatprep.subr.mxu0 %v4864_v26  ;;  %4687 = vmatprep.subr.mxu1 %v5385_v42 }
0x1934   :  { %4681 = vmatpush3.msra.mxu0 %v4864_v26  ;;  %4688 = vmatpush3.msra.mxu1 %v5385_v42  ;;  %v3757_v42 = vpop.permute.xlu1 %3756 }
0x1935   :  { %4689 = vmatprep.subr.mxu1 %v5392_v43  ;;  %4696 = vmatprep.subr.mxu0 %v5409_v45  ;;  %v3777_v6 = vsel %vm455_vm6, %v5685_v3, %v3757_v42 }
0x1936   :  { %4690 = vmatpush3.msra.mxu1 %v5392_v43  ;;  %v3778_v43 = vsel %vm1822_vm10, %v3776_v36, %v3763_v35 }
0x1937   :  { %4691 = vmatprep.subr.mxu1 %v5401_v44 }
0x1938   :  { %4692 = vmatpush3.msra.mxu1 %v5401_v44  ;;  %v3765_v37 = vpop.permute.xlu1 %3764 }
0x1939   :  { %v3779_v58 = vsel %vm1822_vm10, %v3777_v6, %v3765_v37 }
0x19ed   :  { %v3672_v62 = vpop.f32.mrf.mxu0 }
0x19ee   :  { %3770 = vrot.lane.b32.xlu0 %v3672_v62, %s4943_s4 }
0x19ef   :  { %v4668_v41 = vpop.f32.mrf.mxu0 }
0x19f1   :  { %v3748_v30 = vpop.f32.mrf.mxu1 }
0x19f2   :  { %3772 = vrot.lane.b32.xlu1 %v3748_v30, %s4943_s4 }
0x19f3   :  { %v4673_v32 = vpop.f32.mrf.mxu1 }
0x1a60   :  { %v3771_v59 = vpop.permute.xlu0 %3770 }
0x1a61   :  { %v3780_v44 = vsel %vm1825_vm9, %v3778_v43, %v3771_v59 }
0x1a62   :  { %4682 = vmatprep.mubr.msk.f32.mxu0 %vm148_vm0, %v3780_v44 }
0x1a64   :  { %v3773_v61 = vpop.permute.xlu1 %3772 }
0x1a65   :  { %v3781_v27 = vsel %vm1825_vm9, %v3779_v58, %v3773_v61 }
0x1a66   :  { %4683 = vmatmul.mubr.msk.f32.vlgmr.msra.gmra.mxu0 %vm148_vm0, %v3781_v27 }
0x1a67   :  { %4697 = vmatpush3.msra.mxu0 %v5409_v45 }
0x1a68   :  { %4698 = vmatprep.subr.mxu0 %v5414_v46 }
0x1a69   :  { %4699 = vmatpush3.msra.mxu0 %v5414_v46 }
0x1a6a   :  { %4700 = vmatprep.subr.mxu0 %v5421_v47 }
0x1a6b   :  { %4701 = vmatpush3.msra.mxu0 %v5421_v47 }
0x1a6c   :  { %4702 = vmatprep.subr.mxu0 %v5428_v4 }
0x1a6d   :  { %4703 = vmatpush3.msra.mxu0 %v5428_v4  ;;  %v4865_v4 = vld [vmem:[%s5893_s9] ss:$0 sm:$0xff] }
0x1a6e   :  { %4704 = vmatprep.subr.mxu0 %v5435_v38 }
0x1a6f   :  { %4705 = vmatpush3.msra.mxu0 %v5435_v38 }
0x1a70   :  { %4706 = vmatprep.subr.mxu0 %v5442_v48 }
0x1a71   :  { %4707 = vmatpush3.msra.mxu0 %v5442_v48 }
0x1a72   :  { %4708 = vmatprep.subr.mxu0 %v5449_v40 }
0x1a73   :  { %4709 = vmatpush3.msra.mxu0 %v5449_v40 }
0x1a74   :  { %4710 = vmatprep.subr.mxu0 %v5456_v49 }
0x1a75   :  { %4711 = vmatpush3.msra.mxu0 %v5456_v49 }
0x1a76   :  { %4712 = vmatprep.subr.mxu0 %v5463_v51 }
0x1a77   :  { %4713 = vmatpush3.msra.mxu0 %v5463_v51 }
0x1a78   :  { %4714 = vmatprep.subr.mxu0 %v5470_v54 }
0x1a79   :  { %4715 = vmatpush3.msra.mxu0 %v5470_v54 }
0x1a7a   :  { %4716 = vmatprep.subr.mxu0 %v5477_v55 }
0x1a7b   :  { %4717 = vmatpush3.msra.mxu0 %v5477_v55 }
0x1a7c   :  { %4718 = vmatprep.subr.mxu0 %v5484_v56 }
0x1a7d   :  { %4719 = vmatpush3.msra.mxu0 %v5484_v56 }
0x1a7e   :  { %4720 = vmatprep.subr.mxu0 %v5519_v31 }
0x1a7f   :  { %4721 = vmatpush3.msra.mxu0 %v5519_v31 }
0x1a80   :  { %4722 = vmatprep.subr.mxu0 %v5526_v14 }
0x1a81   :  { %4723 = vmatpush3.msra.mxu0 %v5526_v14 }
0x1a82   :  { %4724 = vmatprep.subr.mxu0 %v5533_v15 }
0x1a83   :  { %4725 = vmatpush3.msra.mxu0 %v5533_v15 }
0x1a84   :  { %4726 = vmatprep.subr.mxu0 %v5539_v16 }
0x1a85   :  { %4727 = vmatpush3.msra.mxu0 %v5539_v16 }
0x1b26   :  { %v4684_v45 = vpop.f32.mrf.mxu0 }
0x1b27   :  { %v3864_v46 = vadd.f32 %v4684_v45, %v5561_v57 }
0x1b28   :  { %v3854_v47 = vpop.f32.mrf.mxu0 }
0x1b29   :  { %v3866_v38 = vadd.f32 %v4865_v4, %v3864_v46  ;;  %v3863_v48 = vadd.f32 %v3854_v47, %v5565_v63 }
0x1b2b   :  { %v3865_v40 = vadd.f32 %v4865_v4, %v3863_v48  ;;  %v3870_v49 = vsel %vm148_vm0, %v3866_v38, 0.0 }
0x1b2c   :  { %3871 = vadd.xlane.f32.xlu1 %v3870_v49 }
0x1b2d   :  { %v3867_v51 = vsel %vm148_vm0, %v3865_v40, 0.0 }
0x1b2e   :  { %3868 = vadd.xlane.f32.xlu0 %v3867_v51 }
0x1bb5   :  { %v3872_v54 = vpop.xlane.xlu1 %3871 }
0x1bb6   :  { %v3874_v55 = vmul.f32 0.03125, %v3872_v54 }
0x1bb7   :  { %v3869_v56 = vpop.xlane.xlu0 %3868 }
0x1bb8   :  { %v3873_v31 = vmul.f32 0.03125, %v3869_v56  ;;  %v3876_v14 = vsub.f32 %v3866_v38, %v3874_v55 }
0x1bba   :  { %v3875_v15 = vsub.f32 %v3865_v40, %v3873_v31  ;;  %v3878_v39 = vmul.f32 %v3876_v14, %v3876_v14  ;;  %v3906_v22 = vmul.f32 %v5493_v21, %v3876_v14 }
0x1bbc   :  { %v3877_v16 = vmul.f32 %v3875_v15, %v3875_v15  ;;  %v3882_v63 = vsel %vm148_vm0, %v3878_v39, 0.0  ;;  %v3905_v19 = vmul.f32 %v5493_v21, %v3875_v15 }
0x1bbe   :  { %v3879_v57 = vsel %vm148_vm0, %v3877_v16, 0.0 }
0x1bbf   :  { %3880 = vadd.xlane.f32.xlu0 %v3879_v57 }
0x1bc3   :  { %3883 = vadd.xlane.f32.xlu0 %v3882_v63 }
0x1c48   :  { %v3881_v3 = vpop.xlane.xlu0 %3880 }
0x1c49   :  { %v3885_v7 = vmul.f32 0.032258064, %v3881_v3  ;;  %v4229_v3 = vld [vmem:[%s5902_s18] ss:$0 sm:$0xff]  ;;  %s4906_s18 = scalar_lea.vmem %s4139_s17, 256 }
0x1c4a   :  { %p4907_p10 = scmp.ne.s32.totalorder %s4139_s17, %s4906_s18  ;;  %p4912_p12 = scmp.lt.s32.totalorder %s4906_s18, %s4906_s18 }
0x1c4b   :  { %4832 = vrsqrt.f32 %v3885_v7  ;;  %vm3889_vm4 = vcmp.eq.f32.partialorder %v3885_v7, inf  ;;  %v3892_v18 = vand.u32 2147483648, %v3885_v7  ;;  %vm3891_vm5 = vcmp.eq.f32.partialorder %v3885_v7, 0.0 }
0x1c4c   :  { %v3884_v25 = vpop.xlane.xlu0 %3883  ;;  %p4913_p13 = por %p4912_p12, %p4911_p11 }
0x1c4d   :  { %v3886_v52 = vmul.f32 0.032258064, %v3884_v25 }
0x1c4e   :  { %p4914_p0 = pnand %p4913_p13, %p4907_p10 }
0x1c4f   :  { %4834 = vrsqrt.f32 %v3886_v52  ;;  %vm3896_vm6 = vcmp.eq.f32.partialorder %v3886_v52, inf  ;;  %v3899_v53 = vand.u32 2147483648, %v3886_v52  ;;  %vm3898_vm7 = vcmp.eq.f32.partialorder %v3886_v52, 0.0 }
0x1c58   :  { %v4833_v12 = vpop.eup %4832 }
0x1c59   :  { %v3888_v29 = vmul.f32 %v4833_v12, %v3885_v7 }
0x1c5b   :  { %v3890_v23 = vsel %vm3889_vm4, %v3885_v7, %v3888_v29 }
0x1c5c   :  { %v4835_v2 = vpop.eup %4834  ;;  %v3893_v8 = vsel %vm3891_vm5, %v3892_v18, %v3890_v23 }
0x1c5d   :  { %v3901_v34 = vadd.f32 1e-06, %v3893_v8  ;;  %v3895_v9 = vmul.f32 %v4835_v2, %v3886_v52 }
0x1c5f   :  { %4836 = vrcp.f32 %v3901_v34  ;;  %v3897_v11 = vsel %vm3896_vm6, %v3886_v52, %v3895_v9  ;;  %v4230_v52 = vld [vmem:[%s5903_s19] ss:$0 sm:$0xff] }
0x1c60   :  { %v3900_v10 = vsel %vm3898_vm7, %v3899_v53, %v3897_v11 }
0x1c61   :  { %v3902_v13 = vadd.f32 1e-06, %v3900_v10 }
0x1c63   :  { %4838 = vrcp.f32 %v3902_v13 }
0x1c6c   :  { %v4837_v20 = vpop.eup %4836 }
0x1c6d   :  { %v3907_v60 = vmul.f32 %v4837_v20, %v3905_v19 }
0x1c6f   :  { %v3909_v28 = vadd.f32 %v5500_v50, %v3907_v60 }
0x1c70   :  { %v4839_v1 = vpop.eup %4838 }
0x1c71   :  { %4693 = vmatprep.mubr.msk.f32.mxu1 %vm148_vm0, %v3909_v28  ;;  %v3908_v24 = vmul.f32 %v4839_v1, %v3906_v22 }
0x1c73   :  { %v3910_v5 = vadd.f32 %v5500_v50, %v3908_v24 }
0x1c75   :  { %4694 = vmatmul.mubr.msk.f32.vlgmr.msra.gmra.mxu1 %vm148_vm0, %v3910_v5 }
0x1d35   :  { %v4695_v26 = vpop.f32.mrf.mxu1 }
0x1d36   :  { %v3989_v62 = vadd.f32 %v4695_v26, %v5548_v17 }
0x1d37   :  { %v3983_v41 = vpop.f32.mrf.mxu1 }
0x1d38   :  { %v3984_v30 = vadd.f32 %v5548_v17, %v3983_v41  ;;  %v3993_v33 = vmax.f32 %v3989_v62, 0.0 }
0x1d3a   :  { %v3992_v32 = vmax.f32 %v3984_v30, 0.0 }
0x1d3c   :  { %4728 = vmatprep.mubr.f32.mxu0 %v3992_v32 }
0x1d3d   :  { %4729 = vmatmul.mubr.f32.vlgmr.msra.gmra.mxu0 %v3993_v33 }
0x1dfd   :  { %v4730_v21 = vpop.f32.mrf.mxu0 }
0x1dfe   :  { %v4070_v42 = vadd.f32 %v4730_v21, %v3866_v38 }
0x1dff   :  { %v4060_v35 = vpop.f32.mrf.mxu0 }
0x1e00   :  { %v4069_v36 = vadd.f32 %v4060_v35, %v3865_v40  ;;  %v4072_v37 = vadd.f32 %v5557_v0, %v4070_v42 }
0x1e02   :  { %v4078_v50 = vsel %vm148_vm0, %v4072_v37, 0.0  ;;  %v4071_v43 = vadd.f32 %v5557_v0, %v4069_v36 }
0x1e03   :  { %4079 = vadd.xlane.f32.xlu1 %v4078_v50 }
0x1e04   :  { %v4075_v59 = vsel %vm148_vm0, %v4071_v43, 0.0 }
0x1e05   :  { %4076 = vadd.xlane.f32.xlu0 %v4075_v59 }
0x1e8c   :  { %v4080_v44 = vpop.xlane.xlu1 %4079 }
0x1e8d   :  { %v4082_v17 = vmul.f32 0.03125, %v4080_v44 }
0x1e8e   :  { %v4077_v6 = vpop.xlane.xlu0 %4076 }
0x1e8f   :  { %v4084_v58 = vsub.f32 %v4072_v37, %v4082_v17  ;;  %v4081_v61 = vmul.f32 0.03125, %v4077_v6 }
0x1e91   :  { %v4083_v27 = vsub.f32 %v4071_v43, %v4081_v61  ;;  %v4086_v45 = vmul.f32 %v4084_v58, %v4084_v58  ;;  %v4120_v7 = vmul.f32 %v4229_v3, %v4084_v58 }
0x1e93   :  { %v4090_v46 = vsel %vm148_vm0, %v4086_v45, 0.0  ;;  %v4085_v47 = vmul.f32 %v4083_v27, %v4083_v27  ;;  %v4119_v29 = vmul.f32 %v4229_v3, %v4083_v27 }
0x1e94   :  { %4091 = vadd.xlane.f32.xlu1 %v4090_v46 }
0x1e95   :  { %v4087_v4 = vsel %vm148_vm0, %v4085_v47, 0.0 }
0x1e96   :  { %4088 = vadd.xlane.f32.xlu0 %v4087_v4 }
0x1f1d   :  { %v4092_v38 = vpop.xlane.xlu1 %4091 }
0x1f1e   :  { %v4094_v0 = vmul.f32 0.032258064, %v4092_v38 }
0x1f1f   :  { %v4089_v48 = vpop.xlane.xlu0 %4088 }
0x1f20   :  { %4840 = vrsqrt.f32 %v4094_v0  ;;  %v4093_v40 = vmul.f32 0.032258064, %v4089_v48  ;;  %vm4104_vm8 = vcmp.eq.f32.partialorder %v4094_v0, inf  ;;  %v4107_v54 = vand.u32 2147483648, %v4094_v0 }
0x1f21   :  { %vm4106_vm9 = vcmp.eq.f32.partialorder %v4094_v0, 0.0 }
0x1f22   :  { %4842 = vrsqrt.f32 %v4093_v40  ;;  %vm4097_vm10 = vcmp.eq.f32.partialorder %v4093_v40, inf  ;;  %v4100_v16 = vand.u32 2147483648, %v4093_v40  ;;  %vm4099_vm11 = vcmp.eq.f32.partialorder %v4093_v40, 0.0 }
0x1f2d   :  { %v4841_v49 = vpop.eup %4840 }
0x1f2e   :  { %v4103_v51 = vmul.f32 %v4841_v49, %v4094_v0 }
0x1f2f   :  { %v4843_v55 = vpop.eup %4842 }
0x1f30   :  { %v4105_v56 = vsel %vm4104_vm8, %v4094_v0, %v4103_v51  ;;  %v4096_v14 = vmul.f32 %v4843_v55, %v4093_v40 }
0x1f31   :  { %v4108_v31 = vsel %vm4106_vm9, %v4107_v54, %v4105_v56 }
0x1f32   :  { %v4110_v15 = vadd.f32 1e-06, %v4108_v31  ;;  %v4098_v57 = vsel %vm4097_vm10, %v4093_v40, %v4096_v14 }
0x1f33   :  { %v4101_v39 = vsel %vm4099_vm11, %v4100_v16, %v4098_v57 }
0x1f34   :  { %4844 = vrcp.f32 %v4110_v15  ;;  %v4109_v63 = vadd.f32 1e-06, %v4101_v39 }
0x1f36   :  { %4846 = vrcp.f32 %v4109_v63 }
0x1f41   :  { %v4845_v25 = vpop.eup %4844 }
0x1f42   :  { %v4122_v12 = vmul.f32 %v4845_v25, %v4120_v7 }
0x1f43   :  { %v4847_v18 = vpop.eup %4846 }
0x1f44   :  { %v4130_v23 = vadd.f32 %v4230_v52, %v4122_v12  ;;  %v4121_v2 = vmul.f32 %v4847_v18, %v4119_v29 }
0x1f46   :  { %4132 = vst.msk [vmem:[#allocation7 + $0x8] sm:$0xff] %vm148_vm0, %v4130_v23  ;;  %v4129_v8 = vadd.f32 %v4230_v52, %v4121_v2 }
0x1f48   :  { %4131 = vst.msk [vmem:[#allocation7] sm:$0xff] %vm148_vm0, %v4129_v8 }
0x1f49   :  { %4917 = shalt.err (!%p4914_p0)
}
0x1f4a   :  { %4144 = dma.vmem_to_hbm [thread:$0]  %s4139_s17, 256, %s5904_s20, [#allocation4], %s4933_s24, %s4933_s24, %s4934_s2  }
0x1f4b   :  { %4930 = dma.done.wait [#allocation4], 256  }
0x1f4c   :  { %4931 = vsyncadd [#allocation4], 4294967040 }
0x1f4d   :  { %4148 = vsyncpa [#allocation3], 1 }
0x1f4e   :  { %4149 = vsyncpa [#allocation6], 1 }
0x1f4f   :  { %4150 = vsyncpa [#allocation4], 1 }

</bundles_post_ra>
